<compile_context>
chip_gen: v7x
topology: tpu7x:2x2x1
jax: 0.10.0
libtpu: 0.0.40
codegen_flags: <defaults>
</compile_context>

<pallas_src>
import functools
import math

import jax
import jax.numpy as jnp
import numpy as np
from jax.experimental import pallas as pl
from jax.experimental.pallas import tpu as pltpu

# Model hyper-parameters (small, consistent with the module's __init__).
H = 4            # number of heads
D_MODEL = 32     # d_model
D_K = D_MODEL // H
NEG_INF = -1e9


def mha_kernel(q_ref, k_ref, v_ref, mask_ref,
               w_qkv_ref, b_qkv_ref, wo_ref, bo_ref,
               out_ref, *, compute_dtype):
    TB, S, D = q_ref.shape          # one batch tile per grid step
    M = TB * S

    # ---- fused QKV projection ------------------------------------------
    # Stack the three inputs along rows (sublane axis, cheap) and hit the MXU
    # once with the fused (D, 3D) weight; bias broadcast happens once.
    xq = q_ref[...].reshape(M, D)
    xk = k_ref[...].reshape(M, D)
    xv = v_ref[...].reshape(M, D)
    xs = jnp.concatenate([xq, xk, xv], axis=0).astype(compute_dtype)      # (3M, D)

    y = jnp.dot(xs, w_qkv_ref[...].astype(compute_dtype),
                preferred_element_type=jnp.float32) + b_qkv_ref[...]      # (3M, 3D) f32

    scale = jnp.float32(1.0 / math.sqrt(D_K))
    q = y[0:M, 0:D] * scale          # softmax scale folded into q once
    k = y[M:2 * M, D:2 * D]
    v = y[2 * M:3 * M, 2 * D:3 * D]

    # ---- mask handling hoisted out of the head loop ----------------------
    mask_bias = jnp.where(mask_ref[...] == 0,
                          jnp.float32(NEG_INF), jnp.float32(0.0))          # (TB,S,S)

    # ---- per-head attention; output projection folded per head ----------
    wo = wo_ref[...]
    acc = jnp.zeros((M, D), jnp.float32)
    for hd in range(H):              # static unrolled, H is small
        lo, hi = hd * D_K, (hd + 1) * D_K
        qh = q[:, lo:hi].reshape(TB, S, D_K)
        kh = k[:, lo:hi].reshape(TB, S, D_K)
        vh = v[:, lo:hi].reshape(TB, S, D_K)

        # batched over TB, contraction over D_K — no explicit transpose
        scores = jnp.einsum('bqd,bkd->bqk',
                            qh.astype(compute_dtype), kh.astype(compute_dtype),
                            preferred_element_type=jnp.float32)
        scores = scores + mask_bias

        # softmax along the key axis (f32 math; EUP exp + approx reciprocal)
        m = jnp.max(scores, axis=-1, keepdims=True)
        e = jnp.exp(scores - m)
        inv = pl.reciprocal(jnp.sum(e, axis=-1, keepdims=True), approx=True)
        p = e * inv
        # TODO(synk): nn.Dropout(p=0.1) on p_attn is train-time only; identity here.

        pv = jnp.einsum('bqk,bkd->bqd',
                        p.astype(compute_dtype), vh.astype(compute_dtype),
                        preferred_element_type=jnp.float32)                # (TB,S,D_K)

        # concat_h(pv_h) @ Wo  ==  sum_h pv_h @ Wo[h*Dk:(h+1)*Dk, :]
        acc = acc + jnp.dot(pv.reshape(M, D_K).astype(compute_dtype),
                            wo[lo:hi, :].astype(compute_dtype),
                            preferred_element_type=jnp.float32)

    out = acc + bo_ref[...]
    out_ref[...] = out.reshape(TB, S, D).astype(out_ref.dtype)


def _choose_tb(B, target=8):
    """Largest divisor of B that is <= target while keeping >= 2 grid steps
    (so the batch axis can be sharded across v7x's two TensorCores)."""
    if B <= 1:
        return 1
    best = 1
    for cand in range(1, min(target, B) + 1):
        if B % cand == 0 and (B // cand) >= 2:
            best = cand
    return best


def multi_headed_attention(query, key, value, mask, params,
                           *, batch_tile=8, compute_dtype=jnp.float32):
    """query/key/value: (B, S, D_MODEL); mask: (B, S, S) int32.

    compute_dtype=jnp.bfloat16 enables bf16 MXU inputs (f32 accumulation and
    f32 softmax are kept) on v6e/v7x; default f32 keeps tight numerics.
    """
    B, S, D = query.shape
    wq, bq, wk, bk, wv, bv, wo, bo = params

    # Fuse the three input-projection params: (D, 3D) weight, (1, 3D) bias.
    w_qkv = jnp.concatenate([wq, wk, wv], axis=1)
    b_qkv = jnp.concatenate([bq, bk, bv], axis=1)

    TB = _choose_tb(B, batch_tile)
    grid = (B // TB,)

    x_spec = pl.BlockSpec((TB, S, D), lambda b: (b, 0, 0))
    m_spec = pl.BlockSpec((TB, S, S), lambda b: (b, 0, 0))
    wqkv_spec = pl.BlockSpec((D, 3 * D), lambda b: (0, 0))
    bqkv_spec = pl.BlockSpec((1, 3 * D), lambda b: (0, 0))
    wo_spec = pl.BlockSpec((D, D), lambda b: (0, 0))
    bo_spec = pl.BlockSpec((1, D), lambda b: (0, 0))

    kernel = functools.partial(mha_kernel, compute_dtype=compute_dtype)

    return pl.pallas_call(
        kernel,
        out_shape=jax.ShapeDtypeStruct((B, S, D), query.dtype),
        grid_spec=pltpu.PrefetchScalarGridSpec(
            num_scalar_prefetch=0,
            grid=grid,
            in_specs=[x_spec, x_spec, x_spec, m_spec,
                      wqkv_spec, bqkv_spec, wo_spec, bo_spec],
            out_specs=x_spec,
        ),
        compiler_params=pltpu.CompilerParams(
            dimension_semantics=("parallel",)),
    )(query, key, value, mask, w_qkv, b_qkv, wo, bo)


def reference_mha(q_in, k_in, v_in, mask, params):
    """Pure-JAX reference mirroring the PyTorch forward (dropout = identity)."""
    wq, bq, wk, bk, wv, bv, wo, bo = params
    B, S, D = q_in.shape

    def proj(x, w, b):
        y = x @ w + b
        return y.reshape(B, S, H, D_K).transpose(0, 2, 1, 3)   # (B, H, S, D_K)

    q = proj(q_in, wq, bq)
    k = proj(k_in, wk, bk)
    v = proj(v_in, wv, bv)

    scores = jnp.einsum('bhqd,bhkd->bhqk', q, k) / math.sqrt(D_K)
    scores = jnp.where(mask[:, None, :, :] == 0, -1e9, scores)  # mask.unsqueeze(1)
    p = jax.nn.softmax(scores, axis=-1)
    x = jnp.einsum('bhqk,bhkd->bhqd', p, v)
    x = x.transpose(0, 2, 1, 3).reshape(B, S, D)
    return x @ wo + bo


def init_params(key, d_model):
    """Deterministic init matching nn.Linear shapes; weights stored as (in, out)."""
    bound = 1.0 / math.sqrt(d_model)
    keys = jax.random.split(key, 8)
    params = []
    for i in range(4):  # q, k, v, out
        w = jax.random.uniform(keys[2 * i], (d_model, d_model),
                               minval=-bound, maxval=bound, dtype=jnp.float32)
        b = jax.random.uniform(keys[2 * i + 1], (1, d_model),
                               minval=-bound, maxval=bound, dtype=jnp.float32)
        params += [w, b]
    return tuple(params)


if __name__ == "__main__":
    key = jax.random.PRNGKey(0)
    k_params, k_data = jax.random.split(key)
    params = init_params(k_params, D_MODEL)

    # Two configs: B=8 exercises the batch-tiled path (TB=4, grid=2),
    # B=2 exercises the TB=1 fallback (grid=2 kept for megacore sharding).
    for B, S in ((8, 8), (2, 8)):
        kq, kk, kv = jax.random.split(jax.random.fold_in(k_data, B), 3)
        query = jax.random.normal(kq, (B, S, D_MODEL), dtype=jnp.float32)
        keyx = jax.random.normal(kk, (B, S, D_MODEL), dtype=jnp.float32)
        value = jax.random.normal(kv, (B, S, D_MODEL), dtype=jnp.float32)

        # Causal mask (exercises the masked_fill path); broadcast over heads.
        causal = jnp.tril(jnp.ones((S, S), dtype=jnp.int32))
        mask = jnp.broadcast_to(causal, (B, S, S))

        out = multi_headed_attention(query, keyx, value, mask, params)
        out = jax.block_until_ready(out)

        ref = reference_mha(query, keyx, value, mask, params)
        # Tolerance relaxed vs. exact f32 because softmax normalization uses the
        # EUP approximate reciprocal (pl.reciprocal(approx=True)).
        np.testing.assert_allclose(np.asarray(out), np.asarray(ref),
                                   rtol=2e-3, atol=2e-3)

    print("KERNEL_OK")
</pallas_src>

<mosaic_0001>
module attributes {stable_mosaic.version = 11 : i64} {
  func.func @mha_kernel(%arg0: i32, %arg1: memref<4x8x32xf32, #tpu.memory_space<vmem>>, %arg2: memref<4x8x32xf32, #tpu.memory_space<vmem>>, %arg3: memref<4x8x32xf32, #tpu.memory_space<vmem>>, %arg4: memref<4x8x8xi32, #tpu.memory_space<vmem>>, %arg5: memref<32x96xf32, #tpu.memory_space<vmem>>, %arg6: memref<1x96xf32, #tpu.memory_space<vmem>>, %arg7: memref<32x32xf32, #tpu.memory_space<vmem>>, %arg8: memref<1x32xf32, #tpu.memory_space<vmem>>, %arg9: memref<4x8x32xf32, #tpu.memory_space<vmem>>) attributes {dimension_semantics = [#tpu.dimension_semantics<parallel>], iteration_bounds = array<i64: 2>, scalar_prefetch = 0 : i64, scratch_operands = 0 : i64, tpu.core_type = #tpu.core_type<tc>, window_params = [{transform_indices = @transform_0, window_bounds = array<i64: 4, 8, 32>}, {transform_indices = @transform_1, window_bounds = array<i64: 4, 8, 32>}, {transform_indices = @transform_2, window_bounds = array<i64: 4, 8, 32>}, {transform_indices = @transform_3, window_bounds = array<i64: 4, 8, 8>}, {pipeline_mode = #tpu.pipeline_mode<synchronous>, transform_indices = @transform_4, window_bounds = array<i64: 32, 96>}, {pipeline_mode = #tpu.pipeline_mode<synchronous>, transform_indices = @transform_5, window_bounds = array<i64: 1, 96>}, {pipeline_mode = #tpu.pipeline_mode<synchronous>, transform_indices = @transform_6, window_bounds = array<i64: 32, 32>}, {pipeline_mode = #tpu.pipeline_mode<synchronous>, transform_indices = @transform_7, window_bounds = array<i64: 1, 32>}, {transform_indices = @transform_8, window_bounds = array<i64: 4, 8, 32>}]} {
    %c0 = arith.constant 0 : index
    %c0_0 = arith.constant 0 : index
    %c0_1 = arith.constant 0 : index
    %0 = vector.load %arg1[%c0, %c0_0, %c0_1] : memref<4x8x32xf32, #tpu.memory_space<vmem>>, vector<4x8x32xf32>
    %1 = vector.shape_cast %0 : vector<4x8x32xf32> to vector<32x32xf32>
    %c0_2 = arith.constant 0 : index
    %c0_3 = arith.constant 0 : index
    %c0_4 = arith.constant 0 : index
    %2 = vector.load %arg2[%c0_2, %c0_3, %c0_4] : memref<4x8x32xf32, #tpu.memory_space<vmem>>, vector<4x8x32xf32>
    %3 = vector.shape_cast %2 : vector<4x8x32xf32> to vector<32x32xf32>
    %c0_5 = arith.constant 0 : index
    %c0_6 = arith.constant 0 : index
    %c0_7 = arith.constant 0 : index
    %4 = vector.load %arg3[%c0_5, %c0_6, %c0_7] : memref<4x8x32xf32, #tpu.memory_space<vmem>>, vector<4x8x32xf32>
    %5 = vector.shape_cast %4 : vector<4x8x32xf32> to vector<32x32xf32>
    %6 = tpu.concatenate %1, %3, %5 in 0 : vector<32x32xf32>, vector<32x32xf32>, vector<32x32xf32> -> vector<96x32xf32>
    %c0_8 = arith.constant 0 : index
    %c0_9 = arith.constant 0 : index
    %7 = vector.load %arg5[%c0_8, %c0_9] : memref<32x96xf32, #tpu.memory_space<vmem>>, vector<32x96xf32>
    %cst = arith.constant dense<0.000000e+00> : vector<96x96xf32>
    %8 = tpu.matmul %6, %7, %cst {dimension_numbers = #tpu.dot_dimension_numbers<[1], [0], [0], [1], [0, 0, 1, 1], [], []>} : vector<96x32xf32>, vector<32x96xf32>, vector<96x96xf32> -> vector<96x96xf32>
    %c0_10 = arith.constant 0 : index
    %c0_11 = arith.constant 0 : index
    %9 = vector.load %arg6[%c0_10, %c0_11] : memref<1x96xf32, #tpu.memory_space<vmem>>, vector<1x96xf32>
    %10 = vector.broadcast %9 : vector<1x96xf32> to vector<96x96xf32>
    %11 = arith.addf %8, %10 : vector<96x96xf32>
    %12 = vector.extract_strided_slice %11 {offsets = [0, 0], sizes = [32, 32], strides = [1, 1]} : vector<96x96xf32> to vector<32x32xf32>
    %cst_12 = arith.constant 0.353553385 : f32
    %13 = vector.broadcast %cst_12 : f32 to vector<32x32xf32>
    %14 = arith.mulf %12, %13 : vector<32x32xf32>
    %15 = vector.extract_strided_slice %11 {offsets = [32, 32], sizes = [32, 32], strides = [1, 1]} : vector<96x96xf32> to vector<32x32xf32>
    %16 = vector.extract_strided_slice %11 {offsets = [64, 64], sizes = [32, 32], strides = [1, 1]} : vector<96x96xf32> to vector<32x32xf32>
    %c0_13 = arith.constant 0 : index
    %c0_14 = arith.constant 0 : index
    %c0_15 = arith.constant 0 : index
    %17 = vector.load %arg4[%c0_13, %c0_14, %c0_15] : memref<4x8x8xi32, #tpu.memory_space<vmem>>, vector<4x8x8xi32>
    %c0_i32 = arith.constant 0 : i32
    %18 = vector.broadcast %c0_i32 : i32 to vector<4x8x8xi32>
    %19 = arith.cmpi eq, %17, %18 : vector<4x8x8xi32>
    %cst_16 = arith.constant -1.000000e+09 : f32
    %cst_17 = arith.constant 0.000000e+00 : f32
    %20 = vector.broadcast %cst_16 : f32 to vector<4x8x8xf32>
    %21 = vector.broadcast %cst_17 : f32 to vector<4x8x8xf32>
    %22 = arith.select %19, %20, %21 : vector<4x8x8xi1>, vector<4x8x8xf32>
    %c0_18 = arith.constant 0 : index
    %c0_19 = arith.constant 0 : index
    %23 = vector.load %arg7[%c0_18, %c0_19] : memref<32x32xf32, #tpu.memory_space<vmem>>, vector<32x32xf32>
    %cst_20 = arith.constant 0.000000e+00 : f32
    %24 = vector.broadcast %cst_20 : f32 to vector<32x32xf32>
    %25 = vector.extract_strided_slice %14 {offsets = [0, 0], sizes = [32, 8], strides = [1, 1]} : vector<32x32xf32> to vector<32x8xf32>
    %26 = vector.shape_cast %25 : vector<32x8xf32> to vector<4x8x8xf32>
    %27 = vector.extract_strided_slice %15 {offsets = [0, 0], sizes = [32, 8], strides = [1, 1]} : vector<32x32xf32> to vector<32x8xf32>
    %28 = vector.shape_cast %27 : vector<32x8xf32> to vector<4x8x8xf32>
    %29 = vector.extract_strided_slice %16 {offsets = [0, 0], sizes = [32, 8], strides = [1, 1]} : vector<32x32xf32> to vector<32x8xf32>
    %30 = vector.shape_cast %29 : vector<32x8xf32> to vector<4x8x8xf32>
    "tpu.trace_start"() <{level = 10 : i32, message = "bqd,bkd->bqk"}> : () -> ()
    %cst_21 = arith.constant dense<0.000000e+00> : vector<4x8x8xf32>
    %31 = tpu.matmul %26, %28, %cst_21 {dimension_numbers = #tpu.dot_dimension_numbers<[2], [2], [1], [1], [0, 0, 0, 1, 1, 1], [0], [0]>} : vector<4x8x8xf32>, vector<4x8x8xf32>, vector<4x8x8xf32> -> vector<4x8x8xf32>
    "tpu.trace_stop"() : () -> ()
    %32 = arith.addf %31, %22 : vector<4x8x8xf32>
    %cst_22 = arith.constant dense<0xFF800000> : vector<4x8xf32>
    %33 = vector.multi_reduction <maximumf>, %32, %cst_22 [2] : vector<4x8x8xf32> to vector<4x8xf32>
    %34 = vector.shape_cast %33 : vector<4x8xf32> to vector<4x8x1xf32>
    %35 = vector.broadcast %34 : vector<4x8x1xf32> to vector<4x8x8xf32>
    %36 = arith.subf %32, %35 : vector<4x8x8xf32>
    %37 = math.exp %36 : vector<4x8x8xf32>
    %cst_23 = arith.constant dense<0.000000e+00> : vector<4x8xf32>
    %38 = vector.multi_reduction <add>, %37, %cst_23 [2] : vector<4x8x8xf32> to vector<4x8xf32>
    %39 = vector.shape_cast %38 : vector<4x8xf32> to vector<4x8x1xf32>
    %40 = tpu.reciprocal %39 {approx = true} : vector<4x8x1xf32> -> vector<4x8x1xf32>
    %41 = vector.broadcast %40 : vector<4x8x1xf32> to vector<4x8x8xf32>
    %42 = arith.mulf %37, %41 : vector<4x8x8xf32>
    "tpu.trace_start"() <{level = 10 : i32, message = "bqk,bkd->bqd"}> : () -> ()
    %cst_24 = arith.constant dense<0.000000e+00> : vector<4x8x8xf32>
    %43 = tpu.matmul %42, %30, %cst_24 {dimension_numbers = #tpu.dot_dimension_numbers<[2], [1], [1], [2], [0, 0, 0, 1, 1, 2], [0], [0]>} : vector<4x8x8xf32>, vector<4x8x8xf32>, vector<4x8x8xf32> -> vector<4x8x8xf32>
    "tpu.trace_stop"() : () -> ()
    %44 = vector.shape_cast %43 : vector<4x8x8xf32> to vector<32x8xf32>
    %45 = vector.extract_strided_slice %23 {offsets = [0, 0], sizes = [8, 32], strides = [1, 1]} : vector<32x32xf32> to vector<8x32xf32>
    %cst_25 = arith.constant dense<0.000000e+00> : vector<32x32xf32>
    %46 = tpu.matmul %44, %45, %cst_25 {dimension_numbers = #tpu.dot_dimension_numbers<[1], [0], [0], [1], [0, 0, 1, 1], [], []>} : vector<32x8xf32>, vector<8x32xf32>, vector<32x32xf32> -> vector<32x32xf32>
    %47 = arith.addf %24, %46 : vector<32x32xf32>
    %48 = vector.extract_strided_slice %14 {offsets = [0, 8], sizes = [32, 8], strides = [1, 1]} : vector<32x32xf32> to vector<32x8xf32>
    %49 = vector.shape_cast %48 : vector<32x8xf32> to vector<4x8x8xf32>
    %50 = vector.extract_strided_slice %15 {offsets = [0, 8], sizes = [32, 8], strides = [1, 1]} : vector<32x32xf32> to vector<32x8xf32>
    %51 = vector.shape_cast %50 : vector<32x8xf32> to vector<4x8x8xf32>
    %52 = vector.extract_strided_slice %16 {offsets = [0, 8], sizes = [32, 8], strides = [1, 1]} : vector<32x32xf32> to vector<32x8xf32>
    %53 = vector.shape_cast %52 : vector<32x8xf32> to vector<4x8x8xf32>
    "tpu.trace_start"() <{level = 10 : i32, message = "bqd,bkd->bqk"}> : () -> ()
    %cst_26 = arith.constant dense<0.000000e+00> : vector<4x8x8xf32>
    %54 = tpu.matmul %49, %51, %cst_26 {dimension_numbers = #tpu.dot_dimension_numbers<[2], [2], [1], [1], [0, 0, 0, 1, 1, 1], [0], [0]>} : vector<4x8x8xf32>, vector<4x8x8xf32>, vector<4x8x8xf32> -> vector<4x8x8xf32>
    "tpu.trace_stop"() : () -> ()
    %55 = arith.addf %54, %22 : vector<4x8x8xf32>
    %cst_27 = arith.constant dense<0xFF800000> : vector<4x8xf32>
    %56 = vector.multi_reduction <maximumf>, %55, %cst_27 [2] : vector<4x8x8xf32> to vector<4x8xf32>
    %57 = vector.shape_cast %56 : vector<4x8xf32> to vector<4x8x1xf32>
    %58 = vector.broadcast %57 : vector<4x8x1xf32> to vector<4x8x8xf32>
    %59 = arith.subf %55, %58 : vector<4x8x8xf32>
    %60 = math.exp %59 : vector<4x8x8xf32>
    %cst_28 = arith.constant dense<0.000000e+00> : vector<4x8xf32>
    %61 = vector.multi_reduction <add>, %60, %cst_28 [2] : vector<4x8x8xf32> to vector<4x8xf32>
    %62 = vector.shape_cast %61 : vector<4x8xf32> to vector<4x8x1xf32>
    %63 = tpu.reciprocal %62 {approx = true} : vector<4x8x1xf32> -> vector<4x8x1xf32>
    %64 = vector.broadcast %63 : vector<4x8x1xf32> to vector<4x8x8xf32>
    %65 = arith.mulf %60, %64 : vector<4x8x8xf32>
    "tpu.trace_start"() <{level = 10 : i32, message = "bqk,bkd->bqd"}> : () -> ()
    %cst_29 = arith.constant dense<0.000000e+00> : vector<4x8x8xf32>
    %66 = tpu.matmul %65, %53, %cst_29 {dimension_numbers = #tpu.dot_dimension_numbers<[2], [1], [1], [2], [0, 0, 0, 1, 1, 2], [0], [0]>} : vector<4x8x8xf32>, vector<4x8x8xf32>, vector<4x8x8xf32> -> vector<4x8x8xf32>
    "tpu.trace_stop"() : () -> ()
    %67 = vector.shape_cast %66 : vector<4x8x8xf32> to vector<32x8xf32>
    %68 = vector.extract_strided_slice %23 {offsets = [8, 0], sizes = [8, 32], strides = [1, 1]} : vector<32x32xf32> to vector<8x32xf32>
    %cst_30 = arith.constant dense<0.000000e+00> : vector<32x32xf32>
    %69 = tpu.matmul %67, %68, %cst_30 {dimension_numbers = #tpu.dot_dimension_numbers<[1], [0], [0], [1], [0, 0, 1, 1], [], []>} : vector<32x8xf32>, vector<8x32xf32>, vector<32x32xf32> -> vector<32x32xf32>
    %70 = arith.addf %47, %69 : vector<32x32xf32>
    %71 = vector.extract_strided_slice %14 {offsets = [0, 16], sizes = [32, 8], strides = [1, 1]} : vector<32x32xf32> to vector<32x8xf32>
    %72 = vector.shape_cast %71 : vector<32x8xf32> to vector<4x8x8xf32>
    %73 = vector.extract_strided_slice %15 {offsets = [0, 16], sizes = [32, 8], strides = [1, 1]} : vector<32x32xf32> to vector<32x8xf32>
    %74 = vector.shape_cast %73 : vector<32x8xf32> to vector<4x8x8xf32>
    %75 = vector.extract_strided_slice %16 {offsets = [0, 16], sizes = [32, 8], strides = [1, 1]} : vector<32x32xf32> to vector<32x8xf32>
    %76 = vector.shape_cast %75 : vector<32x8xf32> to vector<4x8x8xf32>
    "tpu.trace_start"() <{level = 10 : i32, message = "bqd,bkd->bqk"}> : () -> ()
    %cst_31 = arith.constant dense<0.000000e+00> : vector<4x8x8xf32>
    %77 = tpu.matmul %72, %74, %cst_31 {dimension_numbers = #tpu.dot_dimension_numbers<[2], [2], [1], [1], [0, 0, 0, 1, 1, 1], [0], [0]>} : vector<4x8x8xf32>, vector<4x8x8xf32>, vector<4x8x8xf32> -> vector<4x8x8xf32>
    "tpu.trace_stop"() : () -> ()
    %78 = arith.addf %77, %22 : vector<4x8x8xf32>
    %cst_32 = arith.constant dense<0xFF800000> : vector<4x8xf32>
    %79 = vector.multi_reduction <maximumf>, %78, %cst_32 [2] : vector<4x8x8xf32> to vector<4x8xf32>
    %80 = vector.shape_cast %79 : vector<4x8xf32> to vector<4x8x1xf32>
    %81 = vector.broadcast %80 : vector<4x8x1xf32> to vector<4x8x8xf32>
    %82 = arith.subf %78, %81 : vector<4x8x8xf32>
    %83 = math.exp %82 : vector<4x8x8xf32>
    %cst_33 = arith.constant dense<0.000000e+00> : vector<4x8xf32>
    %84 = vector.multi_reduction <add>, %83, %cst_33 [2] : vector<4x8x8xf32> to vector<4x8xf32>
    %85 = vector.shape_cast %84 : vector<4x8xf32> to vector<4x8x1xf32>
    %86 = tpu.reciprocal %85 {approx = true} : vector<4x8x1xf32> -> vector<4x8x1xf32>
    %87 = vector.broadcast %86 : vector<4x8x1xf32> to vector<4x8x8xf32>
    %88 = arith.mulf %83, %87 : vector<4x8x8xf32>
    "tpu.trace_start"() <{level = 10 : i32, message = "bqk,bkd->bqd"}> : () -> ()
    %cst_34 = arith.constant dense<0.000000e+00> : vector<4x8x8xf32>
    %89 = tpu.matmul %88, %76, %cst_34 {dimension_numbers = #tpu.dot_dimension_numbers<[2], [1], [1], [2], [0, 0, 0, 1, 1, 2], [0], [0]>} : vector<4x8x8xf32>, vector<4x8x8xf32>, vector<4x8x8xf32> -> vector<4x8x8xf32>
    "tpu.trace_stop"() : () -> ()
    %90 = vector.shape_cast %89 : vector<4x8x8xf32> to vector<32x8xf32>
    %91 = vector.extract_strided_slice %23 {offsets = [16, 0], sizes = [8, 32], strides = [1, 1]} : vector<32x32xf32> to vector<8x32xf32>
    %cst_35 = arith.constant dense<0.000000e+00> : vector<32x32xf32>
    %92 = tpu.matmul %90, %91, %cst_35 {dimension_numbers = #tpu.dot_dimension_numbers<[1], [0], [0], [1], [0, 0, 1, 1], [], []>} : vector<32x8xf32>, vector<8x32xf32>, vector<32x32xf32> -> vector<32x32xf32>
    %93 = arith.addf %70, %92 : vector<32x32xf32>
    %94 = vector.extract_strided_slice %14 {offsets = [0, 24], sizes = [32, 8], strides = [1, 1]} : vector<32x32xf32> to vector<32x8xf32>
    %95 = vector.shape_cast %94 : vector<32x8xf32> to vector<4x8x8xf32>
    %96 = vector.extract_strided_slice %15 {offsets = [0, 24], sizes = [32, 8], strides = [1, 1]} : vector<32x32xf32> to vector<32x8xf32>
    %97 = vector.shape_cast %96 : vector<32x8xf32> to vector<4x8x8xf32>
    %98 = vector.extract_strided_slice %16 {offsets = [0, 24], sizes = [32, 8], strides = [1, 1]} : vector<32x32xf32> to vector<32x8xf32>
    %99 = vector.shape_cast %98 : vector<32x8xf32> to vector<4x8x8xf32>
    "tpu.trace_start"() <{level = 10 : i32, message = "bqd,bkd->bqk"}> : () -> ()
    %cst_36 = arith.constant dense<0.000000e+00> : vector<4x8x8xf32>
    %100 = tpu.matmul %95, %97, %cst_36 {dimension_numbers = #tpu.dot_dimension_numbers<[2], [2], [1], [1], [0, 0, 0, 1, 1, 1], [0], [0]>} : vector<4x8x8xf32>, vector<4x8x8xf32>, vector<4x8x8xf32> -> vector<4x8x8xf32>
    "tpu.trace_stop"() : () -> ()
    %101 = arith.addf %100, %22 : vector<4x8x8xf32>
    %cst_37 = arith.constant dense<0xFF800000> : vector<4x8xf32>
    %102 = vector.multi_reduction <maximumf>, %101, %cst_37 [2] : vector<4x8x8xf32> to vector<4x8xf32>
    %103 = vector.shape_cast %102 : vector<4x8xf32> to vector<4x8x1xf32>
    %104 = vector.broadcast %103 : vector<4x8x1xf32> to vector<4x8x8xf32>
    %105 = arith.subf %101, %104 : vector<4x8x8xf32>
    %106 = math.exp %105 : vector<4x8x8xf32>
    %cst_38 = arith.constant dense<0.000000e+00> : vector<4x8xf32>
    %107 = vector.multi_reduction <add>, %106, %cst_38 [2] : vector<4x8x8xf32> to vector<4x8xf32>
    %108 = vector.shape_cast %107 : vector<4x8xf32> to vector<4x8x1xf32>
    %109 = tpu.reciprocal %108 {approx = true} : vector<4x8x1xf32> -> vector<4x8x1xf32>
    %110 = vector.broadcast %109 : vector<4x8x1xf32> to vector<4x8x8xf32>
    %111 = arith.mulf %106, %110 : vector<4x8x8xf32>
    "tpu.trace_start"() <{level = 10 : i32, message = "bqk,bkd->bqd"}> : () -> ()
    %cst_39 = arith.constant dense<0.000000e+00> : vector<4x8x8xf32>
    %112 = tpu.matmul %111, %99, %cst_39 {dimension_numbers = #tpu.dot_dimension_numbers<[2], [1], [1], [2], [0, 0, 0, 1, 1, 2], [0], [0]>} : vector<4x8x8xf32>, vector<4x8x8xf32>, vector<4x8x8xf32> -> vector<4x8x8xf32>
    "tpu.trace_stop"() : () -> ()
    %113 = vector.shape_cast %112 : vector<4x8x8xf32> to vector<32x8xf32>
    %114 = vector.extract_strided_slice %23 {offsets = [24, 0], sizes = [8, 32], strides = [1, 1]} : vector<32x32xf32> to vector<8x32xf32>
    %cst_40 = arith.constant dense<0.000000e+00> : vector<32x32xf32>
    %115 = tpu.matmul %113, %114, %cst_40 {dimension_numbers = #tpu.dot_dimension_numbers<[1], [0], [0], [1], [0, 0, 1, 1], [], []>} : vector<32x8xf32>, vector<8x32xf32>, vector<32x32xf32> -> vector<32x32xf32>
    %116 = arith.addf %93, %115 : vector<32x32xf32>
    %c0_41 = arith.constant 0 : index
    %c0_42 = arith.constant 0 : index
    %117 = vector.load %arg8[%c0_41, %c0_42] : memref<1x32xf32, #tpu.memory_space<vmem>>, vector<1x32xf32>
    %118 = vector.broadcast %117 : vector<1x32xf32> to vector<32x32xf32>
    %119 = arith.addf %116, %118 : vector<32x32xf32>
    %120 = vector.shape_cast %119 : vector<32x32xf32> to vector<4x8x32xf32>
    %c0_43 = arith.constant 0 : index
    %c0_44 = arith.constant 0 : index
    %c0_45 = arith.constant 0 : index
    %121 = vector.load %arg9[%c0_43, %c0_44, %c0_45] : memref<4x8x32xf32, #tpu.memory_space<vmem>>, vector<4x8x32xf32>
    tpu.vector_store %arg9[%c0_43, %c0_44, %c0_45], %120 {strides = array<i32>} : memref<4x8x32xf32, #tpu.memory_space<vmem>>, vector<4x8x32xf32>,
    return
  }
  func.func @transform_0(%arg0: i32) -> (i32, i32, i32) {
    %c0_i32 = arith.constant 0 : i32
    %c0_i32_0 = arith.constant 0 : i32
    %c0_i32_1 = arith.constant 0 : i32
    return %arg0, %c0_i32, %c0_i32_0 : i32, i32, i32
  }
  func.func @transform_1(%arg0: i32) -> (i32, i32, i32) {
    %c0_i32 = arith.constant 0 : i32
    %c0_i32_0 = arith.constant 0 : i32
    %c0_i32_1 = arith.constant 0 : i32
    return %arg0, %c0_i32, %c0_i32_0 : i32, i32, i32
  }
  func.func @transform_2(%arg0: i32) -> (i32, i32, i32) {
    %c0_i32 = arith.constant 0 : i32
    %c0_i32_0 = arith.constant 0 : i32
    %c0_i32_1 = arith.constant 0 : i32
    return %arg0, %c0_i32, %c0_i32_0 : i32, i32, i32
  }
  func.func @transform_3(%arg0: i32) -> (i32, i32, i32) {
    %c0_i32 = arith.constant 0 : i32
    %c0_i32_0 = arith.constant 0 : i32
    %c0_i32_1 = arith.constant 0 : i32
    return %arg0, %c0_i32, %c0_i32_0 : i32, i32, i32
  }
  func.func @transform_4(%arg0: i32) -> (i32, i32) {
    %c0_i32 = arith.constant 0 : i32
    %c0_i32_0 = arith.constant 0 : i32
    %c0_i32_1 = arith.constant 0 : i32
    return %c0_i32, %c0_i32_0 : i32, i32
  }
  func.func @transform_5(%arg0: i32) -> (i32, i32) {
    %c0_i32 = arith.constant 0 : i32
    %c0_i32_0 = arith.constant 0 : i32
    %c0_i32_1 = arith.constant 0 : i32
    return %c0_i32, %c0_i32_0 : i32, i32
  }
  func.func @transform_6(%arg0: i32) -> (i32, i32) {
    %c0_i32 = arith.constant 0 : i32
    %c0_i32_0 = arith.constant 0 : i32
    %c0_i32_1 = arith.constant 0 : i32
    return %c0_i32, %c0_i32_0 : i32, i32
  }
  func.func @transform_7(%arg0: i32) -> (i32, i32) {
    %c0_i32 = arith.constant 0 : i32
    %c0_i32_0 = arith.constant 0 : i32
    %c0_i32_1 = arith.constant 0 : i32
    return %c0_i32, %c0_i32_0 : i32, i32
  }
  func.func @transform_8(%arg0: i32) -> (i32, i32, i32) {
    %c0_i32 = arith.constant 0 : i32
    %c0_i32_0 = arith.constant 0 : i32
    %c0_i32_1 = arith.constant 0 : i32
    return %arg0, %c0_i32, %c0_i32_0 : i32, i32, i32
  }
}

</mosaic_0001>

<bundles_post_ra>
// kernel: tpu_custom_call.1
= control target key start
LH: loop header
LB: loop body
LE: loop exit
PB: predicated region body
PF: predicated region fallthrough
CT: control target
= control target key end

     0   :  { %s5637_s0 = inlined_call_operand.hbm [shape: f32[8,8,32], index: 0, kind: input, shape index: {}]   ;;  %s5638_s1 = inlined_call_operand.hbm [shape: f32[8,8,32], index: 1, kind: input, shape index: {}]   ;;  %s5639_s2 = inlined_call_operand.hbm [shape: f32[8,8,32], index: 2, kind: input, shape index: {}]   ;;  %s5640_s3 = inlined_call_operand.hbm [shape: s32[8,8,8], index: 3, kind: input, shape index: {}]   ;;  %s5641_s4 = inlined_call_operand.hbm [shape: f32[32,96], index: 4, kind: input, shape index: {}]   ;;  %s5642_s5 = inlined_call_operand.vmem [shape: f32[1,96], index: 5, kind: input, shape index: {}]   ;;  %s5643_s6 = inlined_call_operand.hbm [shape: f32[32,32], index: 6, kind: input, shape index: {}]   ;;  %s5644_s7 = inlined_call_operand.vmem [shape: f32[1,32], index: 7, kind: input, shape index: {}]   ;;  %s5645_s8 = inlined_call_operand.hbm [shape: f32[8,8,32], index: 8, kind: output, shape index: {}]  }
   0x1   :  { %5670 = sst [smem:[#allocation25_spill]] %s5637_s0 }
   0x2   :  { %5671 = sst [smem:[#allocation26_spill]] %s5638_s1 }
   0x3   :  { %5672 = sst [smem:[#allocation27_spill]] %s5641_s4 }
   0x4   :  { %5673 = sst [smem:[#allocation28_spill]] %s5644_s7 }
   0x5   :  { %5674 = sst [smem:[#allocation29_spill]] %s5645_s8 }
   0x6   :  { %13 = vsyncpa [#allocation3], 0 }
   0x7   :  { %15 = vsyncpa [#allocation3 + $0x1], 0 }
   0x8   :  { %16 = vsyncpa [#allocation6], 0 }
   0x9   :  { %18 = vsyncpa [#allocation6 + $0x1], 0 }
   0xa   :  { %19 = vsyncpa [#allocation9], 0 }
   0xb   :  { %21 = vsyncpa [#allocation9 + $0x1], 0 }
   0xc   :  { %22 = vsyncpa [#allocation12], 0 }
   0xd   :  { %23 = vsyncpa [#allocation4], 0 }
   0xe   :  { %25 = vsyncpa [#allocation4 + $0x1], 0  ;;  %s4851_s27 = smov 0   ;;  %s4853_s28 = smov 0  }
   0xf   :  { %s4855_s29 = smov 0   ;;  %s4857_s30 = smov 0  }
  0x10 LB: > { %5675 = sst [smem:[#allocation20_spill]] %s4768_s27  ;;  %s4872_s9 = sadd.s32 4294967295, %s4780_s30   ;;  %s4780_s30 = sphi %s4857_s30, %s5716_s30   ;;  %s4776_s29 = sphi %s4855_s29, %s5720_s29   ;;  %s4772_s28 = sphi %s4853_s28, %s5719_s28   ;;  %s4768_s27 = sphi %s4851_s27, %s5718_s27  }
  0x11   : > { %s3908_s10 = sadd.s32 4294967294, %s4780_s30   ;;  %s4876_s11 = sadd.s32 1, %s4780_s30  }
  0x12   : > { %5676 = sst [smem:[#allocation21_spill]] %s4876_s11  ;;  %s38_s12 = sadd.s32 1, %s4776_s29 }
  0x13   : > { %s35_s13 = ssub.s32 %s4780_s30, %s4876_s11  ;;  %p45_p0 = scmp.ne.s32.totalorder %s4776_s29, %s4772_s28 }
  0x14   : > { %p36_p1 = scmp.eq.s32.totalorder %s35_s13, 0  ;;  %p46_p2 = scmp.eq.s32.totalorder %s4780_s30, 0 }
  0x15   : > { %p51_p3 = scmp.ne.s32.totalorder %s4772_s28, %s4768_s27  ;;  %p5647_p4 = scmp.eq.s32.totalorder %s4872_s9, 0 }
  0x16   : > { %s4888_s14 = scalar_select %p36_p1, %s4776_s29, %s38_s12  }
  0x17   : > { %p4890_p5 = por %p46_p2, %p45_p0  ;;  %p4896_p6 = por %p5647_p4, %p51_p3 }
  0x18   : > { %5677 = sst [smem:[#allocation22_spill]] %s4888_s14  ;;  %p237_p7 = scmp.eq.s32.totalorder %s4872_s9, 1 }
  0x19   : > { %s5678_s15 = scalar_select %p4890_p5, 1, 0 }
  0x1a   : > { %s5679_s16 = scalar_select %p4896_p6, 1, 0 }
  0x1b   : > { %p243_p8 = scmp.eq.s32.totalorder %s3908_s10, 1  ;;  %p3909_p9 = scmp.ge.s32.totalorder %s4780_s30, 1 }
  0x1c   : > { %p250_p10 = scmp.lt.s32.totalorder %s4780_s30, 3  ;;  %p4903_p11 = por %p237_p7, %p45_p0 }
  0x1d   : > { %p4907_p12 = por %p243_p8, %p51_p3  ;;  %s4782_s20 = smov [#allocation10]  }
  0x1e   : > { %s5680_s17 = scalar_select %p4903_p11, 1, 0 }
  0x1f   : > { %s5682_s18 = scalar_select %p4907_p12, 1, 0 }
  0x20   : > { %5681 = sst [smem:[#allocation23_spill]] %s5680_s17  ;;  %p4911_p13 = pnand %p3909_p9, %p250_p10 }
  0x21   : > { %5683 = sst [smem:[#allocation24_spill]] %s5682_s18  ;;  %s262_s21 = sshll.u32 %s4782_s20, 4  ;;  %s263_s21 = int_to_ptr.vmem [resolvable:$true] %s262_s21 }
  0x22   : > { %s5684_s19 = scalar_select %p4911_p13, 1, 0 }
  0x23   : > { %p4377_p1 = pneg %p4911_p13  ;;  %s5646_s23 = sand.u32 1, %s4776_s29  }
  0x24   : > { %s4928_s24 = sshll.u32 %s5646_s23, 5  ;;  %s5686_s4 = sld [smem:[#allocation27_spill]] }
  0x25   : > { %p4919_p2 = pnand %p4377_p1, %p5647_p4 }
  0x27   : > { %s5685_s22 = scalar_select %p4919_p2, 1, 0 }
  0x28   : > { %p5659_p8 = pneg %p4919_p2 }
  0x2a   : > { %s4522_s10 = scalar_lea.hbm %s5686_s4, 512 }
  0x2b   : > { %p4523_p7 = scmp.ne.s32.totalorder %s5686_s4, %s4522_s10  ;;  %p4529_p1 = scmp.lt.u32.totalorder %s4522_s10, %s5686_s4 }
  0x2d   : > { %p4525_p9 = pnand %p5659_p8, %p4523_p7 }
  0x2f   : > { %p4526_p10 = pneg %p4525_p9 }
  0x31   : > { %p4531_p0 = pnand %p4529_p1, %p4526_p10 }
  0x33   : > { %4534 = shalt.err (!%p4531_p0)
}
  0x34   : > { %s4535_s23 = scalar_lea.vmem %s263_s21, 512  ;;  %p4543_p11 = scmp.lt.s32.totalorder %s263_s21, %s263_s21 }
  0x35   : > { %p4536_p4 = scmp.ne.s32.totalorder %s263_s21, %s4535_s23  ;;  %p4544_p6 = scmp.lt.s32.totalorder %s4535_s23, %s4535_s23 }
  0x37   : > { %p4538_p3 = pnand %p4536_p4, %p5659_p8  ;;  %p4545_p13 = por %p4544_p6, %p4543_p11 }
  0x39   : > { %p4539_p12 = pneg %p4538_p3 }
  0x3b   : > { %p4546_p5 = pnand %p4545_p13, %p4539_p12 }
  0x3d   : > { %4549 = shalt.err (!%p4546_p5)
}
  0x3e   : > { %s5654_s25 = smov 128   ;;  %s5656_s14 = smov 8  }
  0x3f   : > { %4380 = dma.hbm_to_vmem [thread:$0]  (!%p4919_p2), %s5686_s4, 512, %s263_s21, [#allocation9], %s5654_s25, %s5654_s25, %s5656_s14  }
  0x40   : > { %s4956_s23 = sshll.u32 %s4780_s30, 9  ;;  %p5687_p4 = scmp.ne.s32.totalorder %s5678_s15, 0 }
  0x41   : > { %p5688_p5 = scmp.lt.s32.totalorder %s4780_s30, 2  ;;  %s5658_s13 = sand.u32 1, %s4780_s30  }
  0x42   : > { %s5690_s1 = sld [smem:[#allocation26_spill]]  ;;  %s320_s21 = scalar_lea.vmem [#allocation5], %s4928_s24 }
  0x43   : > { %p4962_p6 = pnand %p5688_p5, %p5687_p4  ;;  %s327_s26 = sshll.u32 %s320_s21, 4  ;;  %s4974_s26 = int_to_ptr.vmem [resolvable:$true] %s327_s26 }
  0x44   : > { %s4978_s15 = scalar_lea.sflag [#allocation6], %s5658_s13 }
  0x45   : > { %s5689_s12 = scalar_select %p4962_p6, 1, 0 }
  0x46   : > { %p4984_p12 = pneg %p4962_p6 }
  0x48   : > { %s4971_s18 = scalar_lea.hbm %s5690_s1, %s4956_s23  ;;  %s4555_s21 = scalar_lea.hbm %s5690_s1, 1024 }
  0x49   : > { %s4550_s10 = scalar_lea.hbm %s4971_s18, 512  ;;  %p4556_p3 = scmp.lt.u32.totalorder %s4971_s18, %s5690_s1 }
  0x4a   : > { %p4551_p11 = scmp.ne.s32.totalorder %s4971_s18, %s4550_s10  ;;  %p4557_p7 = scmp.lt.u32.totalorder %s4555_s21, %s4550_s10 }
  0x4b   : > { %s5691_s25 = scalar_select %p4984_p12, 1, 0 }
  0x4c   : > { %p4553_p13 = pnand %p4984_p12, %p4551_p11  ;;  %p4558_p9 = por %p4557_p7, %p4556_p3 }
  0x4d   : > { %p4559_p10 = scmp.lt.u32.totalorder %s4550_s10, %s4971_s18 }
  0x4e   : > { %p4554_p0 = pneg %p4553_p13 }
  0x4f   : > { %p4560_p1 = por %p4559_p10, %p4558_p9 }
  0x51   : > { %p4561_p4 = pnand %p4560_p1, %p4554_p0 }
  0x53   : > { %4564 = shalt.err (!%p4561_p4)
}
  0x54   : > { %s4565_s13 = scalar_lea.vmem %s4974_s26, 512  ;;  %s4785_s11 = smov [#allocation5]  }
  0x55   : > { %p4566_p5 = scmp.ne.s32.totalorder %s4974_s26, %s4565_s13  ;;  %s4570_s20 = sshll.u32 %s4785_s11, 4  ;;  %s4571_s20 = int_to_ptr.vmem [resolvable:$false] %s4570_s20 }
  0x56   : > { %s4572_s4 = scalar_lea.vmem %s4571_s20, 1024  ;;  %p4573_p8 = scmp.lt.s32.totalorder %s4974_s26, %s4571_s20 }
  0x57   : > { %p4568_p11 = pnand %p4566_p5, %p4984_p12  ;;  %p4574_p2 = scmp.lt.s32.totalorder %s4572_s4, %s4565_s13 }
  0x59   : > { %p4569_p13 = pneg %p4568_p11  ;;  %p4575_p3 = por %p4574_p2, %p4573_p8 }
  0x5b   : > { %p4576_p7 = pnand %p4575_p3, %p4569_p13 }
  0x5d   : > { %4579 = shalt.err (!%p4576_p7)
}
  0x5e   : > { %s5692_s14 = smov 8   ;;  %s5693_s10 = smov 128  }
  0x5f   : > { %4390 = dma.hbm_to_vmem [thread:$0]  (!%p4962_p6), %s4971_s18, 512, %s4974_s26, %s4978_s15, %s5693_s10, %s5693_s10, %s5692_s14  }
  0x60   : > { %s4786_s21 = smov [#allocation11]   ;;  %s5694_s0 = sld [smem:[#allocation25_spill]] }
  0x61   : > { %s278_s11 = sshll.u32 %s4786_s21, 4  ;;  %s4580_s8 = scalar_lea.hbm %s5643_s6, 512  ;;  %s279_s11 = int_to_ptr.vmem [resolvable:$true] %s278_s11 }
  0x62   : > { %p4581_p2 = scmp.ne.s32.totalorder %s5643_s6, %s4580_s8  ;;  %p5695_p8 = scmp.ne.s32.totalorder %s5685_s22, 0 }
  0x63   : > { %p4587_p1 = scmp.lt.u32.totalorder %s4580_s8, %s5643_s6 }
  0x64   : > { %p5696_p0 = pneg %p5695_p8 }
  0x66   : > { %s5015_s13 = scalar_lea.hbm %s5694_s0, %s4956_s23  ;;  %p4583_p9 = pnand %p4581_p2, %p5696_p0 }
  0x68   : > { %p4584_p10 = pneg %p4583_p9 }
  0x6a   : > { %p4589_p4 = pnand %p4587_p1, %p4584_p10 }
  0x6c   : > { %4592 = shalt.err (!%p4589_p4)
}
  0x6d   : > { %s4593_s1 = scalar_lea.vmem %s279_s11, 512  ;;  %p5697_p11 = pmov %p5696_p0 }
  0x6e   : > { %p4594_p5 = scmp.ne.s32.totalorder %s279_s11, %s4593_s1  ;;  %p4601_p7 = scmp.lt.s32.totalorder %s279_s11, %s279_s11 }
  0x6f   : > { %p4602_p6 = scmp.lt.s32.totalorder %s4593_s1, %s4593_s1 }
  0x70   : > { %p4596_p13 = pnand %p4594_p5, %p5697_p11 }
  0x71   : > { %p4603_p12 = por %p4602_p6, %p4601_p7 }
  0x72   : > { %p4597_p3 = pneg %p4596_p13 }
  0x74   : > { %p4604_p0 = pnand %p4603_p12, %p4597_p3 }
  0x76   : > { %4607 = shalt.err (!%p4604_p0)
}
  0x77   : > { %4383 = dma.hbm_to_vmem [thread:$0]  (!%p5695_p8), %s5643_s6, 512, %s279_s11, [#allocation12], %s5693_s10, %s5693_s10, %s5692_s14  }
  0x78   : > { %s299_s27 = scalar_lea.vmem [#allocation2], %s4928_s24  ;;  %s5047_s20 = scalar_lea.hbm %s5639_s2, %s4956_s23 }
  0x79   : > { %s306_s17 = sshll.u32 %s299_s27, 4  ;;  %s5698_s4 = sand.u32 1, %s4776_s29   ;;  %s5041_s17 = int_to_ptr.vmem [resolvable:$true] %s306_s17 }
  0x7a   : > { %s5051_s18 = scalar_lea.sflag [#allocation3], %s5698_s4  ;;  %s4608_s26 = scalar_lea.hbm %s5015_s13, 512 }
  0x7b   : > { %p4609_p6 = scmp.ne.s32.totalorder %s5015_s13, %s4608_s26  ;;  %p5699_p12 = scmp.ne.s32.totalorder %s5691_s25, 0 }
  0x7c   : > { %s4613_s11 = scalar_lea.hbm %s5694_s0, 1024  ;;  %p4614_p8 = scmp.lt.u32.totalorder %s5015_s13, %s5694_s0 }
  0x7d   : > { %p4611_p2 = pnand %p4609_p6, %p5699_p12  ;;  %p4615_p10 = scmp.lt.u32.totalorder %s4613_s11, %s4608_s26 }
  0x7e   : > { %p4617_p4 = scmp.lt.u32.totalorder %s4608_s26, %s5015_s13 }
  0x7f   : > { %p4612_p9 = pneg %p4611_p2  ;;  %p4616_p1 = por %p4615_p10, %p4614_p8 }
  0x81   : > { %p4618_p5 = por %p4617_p4, %p4616_p1 }
  0x83   : > { %p4619_p11 = pnand %p4618_p5, %p4612_p9 }
  0x85   : > { %4622 = shalt.err (!%p4619_p11)
}
  0x86   : > { %s4623_s22 = scalar_lea.vmem %s5041_s17, 512  ;;  %s4787_s21 = smov [#allocation2]  }
  0x87   : > { %p4624_p13 = scmp.ne.s32.totalorder %s5041_s17, %s4623_s22  ;;  %s4628_s4 = sshll.u32 %s4787_s21, 4  ;;  %s4629_s4 = int_to_ptr.vmem [resolvable:$false] %s4628_s4 }
  0x88   : > { %s4630_s1 = scalar_lea.vmem %s4629_s4, 1024  ;;  %p4631_p0 = scmp.lt.s32.totalorder %s5041_s17, %s4629_s4 }
  0x89   : > { %p4626_p3 = pnand %p4624_p13, %p5699_p12  ;;  %p4632_p6 = scmp.lt.s32.totalorder %s4630_s1, %s4623_s22 }
  0x8b   : > { %p4627_p7 = pneg %p4626_p3  ;;  %p4633_p2 = por %p4632_p6, %p4631_p0 }
  0x8d   : > { %p4634_p8 = pnand %p4633_p2, %p4627_p7 }
  0x8f   : > { %4637 = shalt.err (!%p4634_p8)
}
  0x90   : > { %p5700_p9 = scmp.ne.s32.totalorder %s5689_s12, 0  ;;  %s341_s26 = scalar_lea.vmem [#allocation7], %s4928_s24 }
  0x91   : > { %s348_s7 = sshll.u32 %s341_s26, 4  ;;  %s5085_s27 = scalar_lea.hbm %s5640_s3, %s4956_s23  ;;  %s5079_s7 = int_to_ptr.vmem [resolvable:$true] %s348_s7 }
  0x92   : > { %4387 = dma.hbm_to_vmem [thread:$0]  (!%p5700_p9), %s5015_s13, 512, %s5041_s17, %s5051_s18, %s5693_s10, %s5693_s10, %s5692_s14  }
  0x93   : > { %s4638_s22 = scalar_lea.hbm %s5047_s20, 512  ;;  %s4643_s1 = scalar_lea.hbm %s5639_s2, 1024 }
  0x94   : > { %p4639_p10 = scmp.ne.s32.totalorder %s5047_s20, %s4638_s22  ;;  %p4644_p5 = scmp.lt.u32.totalorder %s5047_s20, %s5639_s2 }
  0x95   : > { %p4645_p11 = scmp.lt.u32.totalorder %s4643_s1, %s4638_s22  ;;  %p4647_p3 = scmp.lt.u32.totalorder %s4638_s22, %s5047_s20 }
  0x96   : > { %p4641_p1 = pnand %p4639_p10, %p5699_p12 }
  0x97   : > { %p4646_p13 = por %p4645_p11, %p4644_p5 }
  0x98   : > { %p4642_p4 = pneg %p4641_p1 }
  0x99   : > { %p4648_p7 = por %p4647_p3, %p4646_p13 }
  0x9b   : > { %p4649_p0 = pnand %p4648_p7, %p4642_p4 }
  0x9d   : > { %4652 = shalt.err (!%p4649_p0)
}
  0x9e   : > { %s4653_s23 = scalar_lea.vmem %s5079_s7, 512  ;;  %s4788_s17 = smov [#allocation7]  }
  0x9f   : > { %p4654_p6 = scmp.ne.s32.totalorder %s5079_s7, %s4653_s23  ;;  %s4658_s18 = sshll.u32 %s4788_s17, 4  ;;  %s4659_s18 = int_to_ptr.vmem [resolvable:$false] %s4658_s18 }
  0xa0   : > { %s4660_s0 = scalar_lea.vmem %s4659_s18, 1024  ;;  %p4661_p10 = scmp.lt.s32.totalorder %s5079_s7, %s4659_s18 }
  0xa1   : > { %p4656_p2 = pnand %p4654_p6, %p5699_p12  ;;  %p4662_p1 = scmp.lt.s32.totalorder %s4660_s0, %s4653_s23 }
  0xa3   : > { %p4657_p8 = pneg %p4656_p2  ;;  %p4663_p5 = por %p4662_p1, %p4661_p10 }
  0xa5   : > { %p4664_p11 = pnand %p4663_p5, %p4657_p8 }
  0xa7   : > { %4667 = shalt.err (!%p4664_p11)
}
  0xa8   : > { %4393 = dma.hbm_to_vmem [thread:$0]  (!%p5700_p9), %s5047_s20, 512, %s5079_s7, %s4978_s15, %s5693_s10, %s5693_s10, %s5692_s14  }
  0xa9   : > { %s362_s26 = scalar_lea.vmem [#allocation8], %s4928_s24  ;;  %s5701_s8 = sand.u32 1, %s4780_s30  }
  0xaa   : > { %s369_s11 = sshll.u32 %s362_s26, 4  ;;  %s5117_s22 = scalar_lea.sflag [#allocation9], %s5701_s8  ;;  %s5113_s11 = int_to_ptr.vmem [resolvable:$true] %s369_s11 }
  0xab   : > { %s4668_s21 = scalar_lea.hbm %s5085_s27, 512  ;;  %s4673_s13 = scalar_lea.hbm %s5640_s3, 1024 }
  0xac   : > { %p4669_p4 = scmp.ne.s32.totalorder %s5085_s27, %s4668_s21  ;;  %p4674_p7 = scmp.lt.u32.totalorder %s5085_s27, %s5640_s3 }
  0xad   : > { %p4675_p0 = scmp.lt.u32.totalorder %s4673_s13, %s4668_s21  ;;  %p4677_p2 = scmp.lt.u32.totalorder %s4668_s21, %s5085_s27 }
  0xae   : > { %p4671_p13 = pnand %p4669_p4, %p5699_p12 }
  0xaf   : > { %p4676_p6 = por %p4675_p0, %p4674_p7 }
  0xb0   : > { %p4672_p3 = pneg %p4671_p13 }
  0xb1   : > { %p4678_p8 = por %p4677_p2, %p4676_p6 }
  0xb3   : > { %p4679_p10 = pnand %p4678_p8, %p4672_p3 }
  0xb5   : > { %4682 = shalt.err (!%p4679_p10)
}
  0xb6   : > { %s4683_s24 = scalar_lea.vmem %s5113_s11, 512  ;;  %s4789_s15 = smov [#allocation8]  }
  0xb7   : > { %p4684_p1 = scmp.ne.s32.totalorder %s5113_s11, %s4683_s24  ;;  %s4688_s20 = sshll.u32 %s4789_s15, 4  ;;  %s4689_s20 = int_to_ptr.vmem [resolvable:$false] %s4688_s20 }
  0xb8   : > { %s4690_s7 = scalar_lea.vmem %s4689_s20, 1024  ;;  %p4691_p4 = scmp.lt.s32.totalorder %s5113_s11, %s4689_s20 }
  0xb9   : > { %p4686_p5 = pnand %p4684_p1, %p5699_p12  ;;  %p4692_p13 = scmp.lt.s32.totalorder %s4690_s7, %s4683_s24 }
  0xbb   : > { %p4687_p11 = pneg %p4686_p5  ;;  %p4693_p7 = por %p4692_p13, %p4691_p4 }
  0xbd   : > { %p4694_p0 = pnand %p4693_p7, %p4687_p11 }
  0xbf   : > { %4697 = shalt.err (!%p4694_p0)
}
  0xc0   : > { %4396 = dma.hbm_to_vmem [thread:$0]  (!%p5700_p9), %s5085_s27, 512, %s5113_s11, %s5117_s22, %s5693_s10, %s5693_s10, %s5692_s14  }
  0xc1   : > { %p5702_p12 = scmp.ne.s32.totalorder %s5684_s19, 0 }
  0xc2   : > { %s5147_s25 = sand.u32 (!%p5702_p12), 1, %s4772_s28   ;;  %p5703_p3 = scmp.ne.s32.totalorder (!%p5702_p12), %s5679_s16, 0 }
  0xc3   : > { %381 = sbr.rel (%p5702_p12) target bundleno = 3381 (0xd35), region = 52  ;;  %s5150_s18 = sshll.u32 (!%p5702_p12), %s5147_s25, 5 }
  0xc4   : > { %s384_s12 = scalar_lea.sflag (!%p5702_p12), [#allocation3], %s5147_s25  ;;  %s5154_s0 = scalar_lea.vmem (!%p5702_p12), [#allocation2], %s5150_s18 }
  0xca   : > { %4743 = dma.done.wait (%p5703_p3), %s384_s12, 512  }
  0xcb   : > { %4745 = vsyncadd (%p5703_p3), %s384_s12, 4294966784  ;;  %s392_s19 = sand.u32 1, %s4872_s9   ;;  %s5162_s10 = scalar_lea.vmem [#allocation5], %s5150_s18 }
  0xcc   : > { %s393_s14 = scalar_lea.sflag [#allocation6], %s392_s19 }
  0xcd   : > { %4747 = dma.done.wait (%p5703_p3), %s393_s14, 1024  }
  0xce   : > { %4749 = vsyncadd (%p5703_p3), %s393_s14, 4294966272  ;;  %s5169_s27 = scalar_lea.vmem [#allocation7], %s5150_s18  ;;  %s411_s26 = scalar_lea.sflag [#allocation9], %s392_s19 }
  0xcf   : > { %s5172_s11 = scalar_lea.vmem [#allocation8], %s5150_s18 }
  0xd0   : > { %4751 = dma.done.wait (%p5703_p3), %s411_s26, 512  }
  0xd1   : > { %4753 = vsyncadd (%p5703_p3), %s411_s26, 4294966784  ;;  %p5704_p9 = scmp.eq.s32.totalorder %s4872_s9, 0 }
  0xd3   : > { %4755 = dma.done.wait (%p5704_p9), [#allocation9], 512   ;;  %p5705_p6 = pmov %p5704_p9 }
  0xd5   : > { %4757 = vsyncadd (%p5705_p6), [#allocation9], 4294966784  ;;  %p5706_p2 = pmov %p5705_p6 }
  0xd7   : > { %4759 = dma.done.wait (%p5706_p2), [#allocation12], 512   ;;  %p5707_p8 = pmov %p5706_p2 }
  0xd8   : > { %vm498_vm0 = vcmask 261120   ;;  %v487_v0 = vld [vmem:[#allocation10] sm:$0xff]  ;;  %v488_v1 = vld [vmem:[#allocation10 + $0x8] sm:$0xff]  ;;  %v489_v2 = vld [vmem:[#allocation10 + $0x10] sm:$0xff]  ;;  %v4790_v14 = vmov 0.0   ;;  %vm4791_vm1 = vmmov 0  }
  0xd9   : > { %4761 = vsyncadd (%p5707_p8), [#allocation12], 4294966784  ;;  %v4339_v3 = vpack.c.bf16 %v488_v1, %v487_v0  ;;  %v490_v4 = vld [vmem:[#allocation10 + $0x18] sm:$0xff]  ;;  %v475_v5 = vld [vmem:[%s5154_s0] sm:$0xff]  ;;  %4147 = vmatprep.subr.mxu1 %v4790_v14  ;;  %4149 = vmatprep.mubr.msk.f32.mxu1 %vm4791_vm1, %v4790_v14  ;;  %s4792_s22 = smov 96   ;;  %s4793_s21 = smov 88  }
  0xda   : > { %v4343_v6 = vpack.c.bf16 %v490_v4, %v489_v2  ;;  %4129 = vmatprep.mubr.msk.f32.mxu0 %vm498_vm0, %v475_v5  ;;  %v476_v7 = vld [vmem:[%s5154_s0 + $0x8] sm:$0xff]  ;;  %v477_v8 = vld [vmem:[%s5154_s0 + $0x10] sm:$0xff]  ;;  %v478_v9 = vld [vmem:[%s5154_s0 + $0x18] sm:$0xff]  ;;  %vm683_vm2 = vcmask 64512   ;;  %s4794_s4 = smov 64   ;;  %s4795_s1 = smov 120  }
  0xdb   : > { %4340 = vmatprep.subr.bf16.mxu0 %v4339_v3  ;;  %v479_v10 = vld [vmem:[%s5162_s10] sm:$0xff]  ;;  %v480_v11 = vld [vmem:[%s5162_s10 + $0x8] sm:$0xff]  ;;  %v481_v12 = vld [vmem:[%s5162_s10 + $0x10] sm:$0xff]  ;;  %s4796_s13 = smov 56   ;;  %s4797_s23 = smov 80  }
  0xdc   : > { %4342 = vmatpush3.bf16.msra.mxu0 %v4339_v3  ;;  %v482_v13 = vld [vmem:[%s5162_s10 + $0x18] sm:$0xff]  ;;  %v5209_v20 = vld [vmem:[%s5642_s5] ss:$0 sm:$0xff]  ;;  %v484_v28 = vld [vmem:[%s5169_s27 + $0x8] sm:$0xff]  ;;  %s4798_s17 = smov 112   ;;  %s4799_s24 = smov 48  }
  0xdd   : > { %4344 = vmatprep.subr.bf16.mxu0 %v4343_v6  ;;  %v483_v27 = vld [vmem:[%s5169_s27] sm:$0xff]  ;;  %v485_v29 = vld [vmem:[%s5169_s27 + $0x10] sm:$0xff]  ;;  %v486_v31 = vld [vmem:[%s5169_s27 + $0x18] sm:$0xff]  ;;  %s4800_s15 = smov 104   ;;  %s4801_s20 = smov 72  }
  0xde   : > { %v667_v50 = vld [vmem:[%s5172_s11 + $0x18] sm:$0xff]  ;;  %v665_v61 = vld [vmem:[%s5172_s11 + $0x8] sm:$0xff]  ;;  %v666_v62 = vld [vmem:[%s5172_s11 + $0x10] sm:$0xff]  ;;  %s4802_s7 = smov 40   ;;  %s5708_s19 = sld [smem:[#allocation28_spill]] }
  0xdf   : > { %vm671_vm3 = vcmp.eq.s32.totalorder %v667_v50, 0  ;;  %vm669_vm4 = vcmp.eq.s32.totalorder %v665_v61, 0  ;;  %vm670_vm5 = vcmp.eq.s32.totalorder %v666_v62, 0  ;;  %s469_s14 = scalar_lea.vmem [#allocation13], %s5150_s18  ;;  %s5709_s10 = sld [smem:[#allocation23_spill]] }
  0xe0   : > { %4346 = vmatpush3.bf16.msra.mxu0 %v4343_v6  ;;  %v5279_v54 = vsel %vm671_vm3, -1e+09, %v4790_v14  ;;  %v5297_v63 = vsel %vm669_vm4, -1e+09, %v4790_v14  ;;  %v5301_v1 = vsel %vm670_vm5, -1e+09, %v4790_v14 }
  0xe1   : > { %4182 = vmatprep.subr.mxu0 %v4790_v14  ;;  %s3750_s27 = sshll.u32 %s469_s14, 4  ;;  %s4020_s26 = sshll.u32 %s4872_s9, 9  ;;  %s5586_s27 = int_to_ptr.vmem [resolvable:$true] %s3750_s27 }
  0xe2   : > { %s5710_s8 = sld [smem:[#allocation29_spill]]  ;;  %s3737_s18 = scalar_lea.sflag [#allocation4], %s5147_s25 }
  0xe3   : > { %4130 = vmatmul.mubr.msk.f32.vlgmr.msra.gmra.mrb[0].mxu0 %vm498_vm0, %v476_v7  ;;  %s4698_s9 = scalar_lea.vmem %s5586_s27, 512 }
  0xe4   : > { %4132 = vmatprep.mubr.msk.f32.mxu0 %vm498_vm0, %v477_v8  ;;  %p4699_p10 = scmp.ne.s32.totalorder %s5586_s27, %s4698_s9 }
  0xe5   : > { %p5711_p1 = scmp.ne.s32.totalorder %s5709_s10, 0 }
  0xe7   : > { %4133 = vmatmul.mubr.msk.f32.gmra.mrb[2].mxu0 %vm498_vm0, %v478_v9  ;;  %p4700_p5 = pnand %p4699_p10, %p5711_p1 }
  0xe8   : > { %4135 = vmatprep.mubr.msk.f32.mxu0 %vm498_vm0, %v479_v10 }
  0xe9   : > { %p4701_p11 = pneg %p4700_p5 }
  0xeb   : > { %4136 = vmatmul.mubr.msk.f32.gmra.mrb[4].mxu0 %vm498_vm0, %v480_v11 }
  0xec   : > { %4138 = vmatprep.mubr.msk.f32.mxu0 %vm498_vm0, %v481_v12  ;;  %v664_v12 = vld [vmem:[%s5172_s11] sm:$0xff] }
  0xed   : > { %vm668_vm6 = vcmp.eq.s32.totalorder %v664_v12, 0 }
  0xef   : > { %4139 = vmatmul.mubr.msk.f32.gmra.mrb[6].mxu0 %vm498_vm0, %v482_v13 }
  0xf0   : > { %4141 = vmatprep.mubr.msk.f32.mxu0 %vm498_vm0, %v483_v27 }
  0xf3   : > { %4142 = vmatmul.mubr.msk.f32.gmra.mrb[8].mxu0 %vm498_vm0, %v484_v28 }
  0xf4   : > { %4144 = vmatprep.mubr.msk.f32.mxu0 %vm498_vm0, %v485_v29 }
  0xf7   : > { %4145 = vmatmul.mubr.msk.f32.gmra.mrb[10].mxu0 %vm498_vm0, %v486_v31 }
  0xf8   : > { %4184 = vmatprep.mubr.msk.f32.mxu0 %vm4791_vm1, %v4790_v14 }
 0x1b6   : > { %v4131_v15 = vpop.f32.mrb[0].mxu0 }
 0x1b7   : > { %v601_v16 = vpop.f32.mrb[1].mxu0  ;;  %v607_v34 = vadd.f32 %v4131_v15, %v5209_v20 }
 0x1b8   : > { %v602_v32 = vadd.f32 %v5209_v20, %v601_v16  ;;  %v5312_v16 = vsel %vm668_vm6, -1e+09, %v4790_v14 }
 0x1b9   : > { %v5250_v37 = vmul.f32 0.35355338, %v607_v34 }
 0x1ba   : > { %v4134_v17 = vpop.f32.mrb[2].mxu0  ;;  %v5242_v35 = vmul.f32 0.35355338, %v602_v32 }
 0x1bb   : > { %v611_v18 = vpop.f32.mrb[3].mxu0  ;;  %v617_v40 = vadd.f32 %v4134_v17, %v5209_v20 }
 0x1bc   : > { %v612_v38 = vadd.f32 %v5209_v20, %v611_v18 }
 0x1bd   : > { %v5268_v43 = vmul.f32 0.35355338, %v617_v40 }
 0x1be   : > { %v4137_v19 = vpop.f32.mrb[4].mxu0  ;;  %v5260_v41 = vmul.f32 0.35355338, %v612_v38 }
 0x1bf   : > { %v621_v21 = vpop.f32.mrb[5].mxu0  ;;  %v5216_v25 = vadd.f32 %v4137_v19, %v5209_v20 }
 0x1c0   : > { %v5212_v22 = vadd.f32 %v5209_v20, %v621_v21 }
 0x1c2   : > { %v4140_v23 = vpop.f32.mrb[6].mxu0  ;;  %681 = vrot.lane.b32.xlu0 %v5212_v22, %s4792_s22 }
 0x1c3   : > { %v631_v24 = vpop.f32.mrb[7].mxu0  ;;  %v5226_v30 = vadd.f32 %v4140_v23, %v5209_v20 }
 0x1c4   : > { %v5219_v26 = vadd.f32 %v5209_v20, %v631_v24 }
 0x1c6   : > { %838 = vrot.lane.b32.xlu1 %v5219_v26, %s4792_s22  ;;  %760 = vrot.lane.b32.xlu0 %v5216_v25, %s4792_s22  ;;  %v5275_v44 = vpop.f32.mrb[8].mxu0 }
 0x1c7   : > { %v641_v45 = vpop.f32.mrb[9].mxu0 }
 0x1c8   : > { %v5318_v27 = vadd.f32 %v5209_v20, %v641_v45 }
 0x1ca   : > { %916 = vrot.lane.b32.xlu1 %v5226_v30, %s4792_s22  ;;  %v4146_v46 = vpop.f32.mrb[10].mxu0  ;;  %s5591_s22 = scalar_lea.hbm %s5710_s8, %s4020_s26 }
 0x1cb   : > { %v5284_v59 = vadd.f32 %v4146_v46, %v5209_v20  ;;  %v5292_v60 = vpop.f32.mrb[11].mxu0 }
 0x1ce   : > { %1425 = vrot.lane.b32.xlu1 %v5216_v25, %s4793_s21 }
 0x234   : > { %v682_v33 = vpop.permute.xlu0 %681 }
 0x235   : > { %4148 = vmatpush3.xpose.msk.msra.mxu1 %vm683_vm2, %v682_v33 }
 0x236   : > { %4152 = vmatprep.subr.mxu1 %v4790_v14 }
 0x238   : > { %v761_v36 = vpop.permute.xlu0 %760  ;;  %4150 = vmatmul.mubr.msk.f32.vlgmr.msra.gmra.mrb[0].mxu1 %vm683_vm2, %v5242_v35  ;;  %v839_v39 = vpop.permute.xlu1 %838 }
 0x239   : > { %4153 = vmatpush3.xpose.msk.msra.mxu1 %vm683_vm2, %v761_v36  ;;  %4154 = vmatprep.mubr.msk.f32.mxu1 %vm4791_vm1, %v4790_v14 }
 0x23a   : > { %4157 = vmatprep.subr.mxu1 %v4790_v14 }
 0x23c   : > { %4155 = vmatmul.mubr.msk.f32.vlgmr.msra.gmra.mrb[2].mxu1 %vm683_vm2, %v5250_v37  ;;  %v917_v42 = vpop.permute.xlu1 %916 }
 0x23d   : > { %4158 = vmatpush3.xpose.msk.msra.mxu1 %vm683_vm2, %v839_v39  ;;  %4159 = vmatprep.mubr.msk.f32.mxu1 %vm4791_vm1, %v4790_v14 }
 0x23e   : > { %4162 = vmatprep.subr.mxu1 %v4790_v14 }
 0x240   : > { %4160 = vmatmul.mubr.msk.f32.vlgmr.msra.gmra.mrb[4].mxu1 %vm683_vm2, %v5260_v41  ;;  %v1426_v28 = vpop.permute.xlu1 %1425 }
 0x241   : > { %4163 = vmatpush3.xpose.msk.msra.mxu1 %vm683_vm2, %v917_v42  ;;  %4164 = vmatprep.mubr.msk.f32.mxu1 %vm4791_vm1, %v4790_v14 }
 0x242   : > { %4167 = vmatprep.subr.mxu1 %v4790_v14 }
 0x244   : > { %4165 = vmatmul.mubr.msk.f32.vlgmr.msra.gmra.mrb[6].mxu1 %vm683_vm2, %v5268_v43 }
 0x245   : > { %4169 = vmatprep.mubr.msk.f32.mxu1 %vm4791_vm1, %v4790_v14 }
 0x30b   : > { %v755_v47 = vpop.f32.mrb[0].mxu1 }
 0x30c   : > { %v4151_v48 = vpop.f32.mrb[1].mxu1  ;;  %v756_v19 = vadd.f32 %v755_v47, %v5312_v16 }
 0x30e   : > { %v993_v21 = vsel %vm683_vm2, %v756_v19, -inf }
 0x30f   : > { %v833_v49 = vpop.f32.mrb[2].mxu1 }
 0x310   : > { %v4156_v51 = vpop.f32.mrb[3].mxu1  ;;  %v834_v0 = vadd.f32 %v833_v49, %v5297_v63 }
 0x311   : > { %v5344_v51 = vadd.f32 %v5275_v44, %v5209_v20 }
 0x312   : > { %v996_v3 = vsel %vm683_vm2, %v834_v0, -inf }
 0x313   : > { %v911_v52 = vpop.f32.mrb[4].mxu1 }
 0x314   : > { %v4161_v53 = vpop.f32.mrb[5].mxu1  ;;  %v912_v2 = vadd.f32 %v911_v52, %v5301_v1  ;;  %v5350_v52 = vadd.f32 %v5209_v20, %v5292_v60 }
 0x316   : > { %v999_v4 = vsel %vm683_vm2, %v912_v2, -inf }
 0x317   : > { %v989_v55 = vpop.f32.mrb[6].mxu1 }
 0x318   : > { %v990_v56 = vadd.f32 %v989_v55, %v5279_v54  ;;  %v4166_v57 = vpop.f32.mrb[7].mxu1 }
 0x31a   : > { %v1002_v58 = vsel %vm683_vm2, %v990_v56, -inf }
 0x31b   : > { %1003 = vmax.xlane.f32.xlu0 %v1002_v58 }
 0x331   : > { %1269 = vrot.lane.b32.xlu0 %v5284_v59, %s4794_s4 }
 0x335   : > { %1423 = vrot.lane.b32.xlu0 %v5250_v37, %s4795_s1 }
 0x339   : > { %1579 = vrot.lane.b32.xlu0 %v5268_v43, %s4795_s1 }
 0x358   : > { %997 = vmax.xlane.f32.xlu0 %v996_v3 }
 0x35c   : > { %1000 = vmax.xlane.f32.xlu0 %v999_v4 }
 0x3a8   : > { %v1004_v5 = vpop.xlane.xlu0 %1003 }
 0x3a9   : > { %v1008_v6 = vsub.f32 %v990_v56, %v1004_v5 }
 0x3ab   : > { %v1015_v7 = vmul.f32 1.442695, %v1008_v6 }
 0x3ac   : > { %v1270_v8 = vpop.permute.xlu0 %1269 }
 0x3ad   : > { %4458 = vpow2.f32 %v1015_v7  ;;  %4183 = vmatpush3.msra.mxu0 %v1270_v8 }
 0x3ae   : > { %4192 = vmatprep.subr.mxu0 %v4790_v14 }
 0x3b0   : > { %v1424_v11 = vpop.permute.xlu0 %1423 }
 0x3b4   : > { %v1580_v13 = vpop.permute.xlu0 %1579 }
 0x3b7   : > { %v4459_v9 = vpop.eup %4458 }
 0x3b8   : > { %v1026_v10 = vsel %vm683_vm2, %v4459_v9, 0.0 }
 0x3b9   : > { %1027 = vadd.xlane.f32.xlu1 %v1026_v10 }
 0x3ca   : > { %1581 = vrot.lane.b32.xlu1 %v5226_v30, %s4793_s21 }
 0x3e5   : > { %v998_v15 = vpop.xlane.xlu0 %997 }
 0x3e6   : > { %v1006_v17 = vsub.f32 %v834_v0, %v998_v15 }
 0x3e8   : > { %v1011_v18 = vmul.f32 1.442695, %v1006_v17 }
 0x3e9   : > { %v1001_v34 = vpop.xlane.xlu0 %1000 }
 0x3ea   : > { %4460 = vpow2.f32 %v1011_v18  ;;  %v1007_v36 = vsub.f32 %v912_v2, %v1001_v34 }
 0x3ec   : > { %v1013_v40 = vmul.f32 1.442695, %v1007_v36 }
 0x3ee   : > { %994 = vmax.xlane.f32.xlu1 %v993_v21 }
 0x3f4   : > { %v4461_v23 = vpop.eup %4460 }
 0x3f5   : > { %v1020_v24 = vsel %vm683_vm2, %v4461_v23, 0.0 }
 0x3f6   : > { %1021 = vadd.xlane.f32.xlu0 %v1020_v24 }
 0x40c   : > { %1038 = vrot.lane.b32.xlu0 %v5318_v27, %s4794_s4 }
 0x410   : > { %1347 = vrot.lane.b32.xlu0 %v5212_v22, %s4793_s21 }
 0x414   : > { %1503 = vrot.lane.b32.xlu0 %v5219_v26, %s4793_s21  ;;  %s4803_s21 = smov [#allocation13]  }
 0x446   : > { %v1028_v29 = vpop.xlane.xlu1 %1027 }
 0x447   : > { %4462 = vrcp.f32 %v1028_v29 }
 0x44a   : > { %v1582_v33 = vpop.permute.xlu1 %1581 }
 0x451   : > { %v4463_v31 = vpop.eup %4462 }
 0x452   : > { %v1036_v32 = vmul.f32 %v4463_v31, %v4459_v9 }
 0x454   : > { %4185 = vmatmul.mubr.msk.f32.vlgmr.msra.gmra.mrb[12].mxu0 %vm683_vm2, %v1036_v32 }
 0x455   : > { %4193 = vmatpush3.xpose.msk.msra.mxu0 %vm683_vm2, %v1426_v28  ;;  %4194 = vmatprep.mubr.msk.f32.mxu0 %vm4791_vm1, %v4790_v14 }
 0x456   : > { %4202 = vmatprep.subr.mxu0 %v4790_v14 }
 0x458   : > { %4195 = vmatmul.mubr.msk.f32.vlgmr.msra.gmra.mrb[14].mxu0 %vm683_vm2, %v1424_v11 }
 0x459   : > { %4203 = vmatpush3.xpose.msk.msra.mxu0 %vm683_vm2, %v1582_v33  ;;  %4204 = vmatprep.mubr.msk.f32.mxu0 %vm4791_vm1, %v4790_v14 }
 0x45a   : > { %4212 = vmatprep.subr.mxu0 %v4790_v14 }
 0x45c   : > { %4205 = vmatmul.mubr.msk.f32.vlgmr.msra.gmra.mrb[16].mxu0 %vm683_vm2, %v1580_v13 }
 0x45d   : > { %4214 = vmatprep.mubr.msk.f32.mxu0 %vm4791_vm1, %v4790_v14 }
 0x47b   : > { %v995_v38 = vpop.xlane.xlu1 %994 }
 0x47c   : > { %v1005_v39 = vsub.f32 %v756_v19, %v995_v38 }
 0x47e   : > { %v1009_v42 = vmul.f32 1.442695, %v1005_v39 }
 0x480   : > { %4464 = vpow2.f32 %v1009_v42 }
 0x481   : > { %4466 = vpow2.f32 %v1013_v40 }
 0x483   : > { %v1022_v45 = vpop.xlane.xlu0 %1021 }
 0x487   : > { %v1039_v46 = vpop.permute.xlu0 %1038 }
 0x488   : > { %4168 = vmatpush3.msra.mxu1 %v1039_v46 }
 0x489   : > { %4172 = vmatprep.subr.mxu1 %v4790_v14 }
 0x48a   : > { %v4465_v47 = vpop.eup %4464 }
 0x48b   : > { %v1017_v48 = vsel %vm683_vm2, %v4465_v47, 0.0  ;;  %v4467_v49 = vpop.eup %4466  ;;  %v1348_v8 = vpop.permute.xlu0 %1347 }
 0x48c   : > { %1018 = vadd.xlane.f32.xlu1 %v1017_v48  ;;  %v1023_v50 = vsel %vm683_vm2, %v4467_v49, 0.0 }
 0x48f   : > { %v1504_v13 = vpop.permute.xlu0 %1503 }
 0x490   : > { %1024 = vadd.xlane.f32.xlu1 %v1023_v50 }
 0x4a1   : > { %1115 = vrot.lane.b32.xlu1 %v5344_v51, %s4794_s4 }
 0x4a5   : > { %1192 = vrot.lane.b32.xlu1 %v5350_v52, %s4794_s4  ;;  %s4702_s4 = sshll.u32 %s4803_s21, 4  ;;  %s4703_s4 = int_to_ptr.vmem [resolvable:$false] %s4702_s4 }
 0x4a6   : > { %p4705_p4 = scmp.lt.s32.totalorder %s5586_s27, %s4703_s4 }
 0x4a9   : > { %1345 = vrot.lane.b32.xlu1 %v5242_v35, %s4795_s1 }
 0x4ad   : > { %1501 = vrot.lane.b32.xlu1 %v5260_v41, %s4795_s1  ;;  %s4704_s1 = scalar_lea.vmem %s4703_s4, 1024 }
 0x4ae   : > { %p4706_p13 = scmp.lt.s32.totalorder %s4704_s1, %s4698_s9 }
 0x4b0   : > { %p4707_p7 = por %p4706_p13, %p4705_p4 }
 0x4b2   : > { %p4708_p0 = pnand %p4707_p7, %p4701_p11 }
 0x519   : > { %v1019_v53 = vpop.xlane.xlu1 %1018 }
 0x51a   : > { %4468 = vrcp.f32 %v1019_v53 }
 0x51b   : > { %4470 = vrcp.f32 %v1022_v45 }
 0x51d   : > { %v1025_v44 = vpop.xlane.xlu1 %1024 }
 0x51e   : > { %4472 = vrcp.f32 %v1025_v44 }
 0x521   : > { %v1116_v57 = vpop.permute.xlu1 %1115 }
 0x524   : > { %v4469_v55 = vpop.eup %4468 }
 0x525   : > { %v1033_v56 = vmul.f32 %v4469_v55, %v4465_v47  ;;  %v4471_v58 = vpop.eup %4470  ;;  %v1193_v0 = vpop.permute.xlu1 %1192 }
 0x526   : > { %v1034_v61 = vmul.f32 %v4471_v58, %v4461_v23 }
 0x527   : > { %4170 = vmatmul.mubr.msk.f32.vlgmr.msra.gmra.mrb[8].mxu1 %vm683_vm2, %v1033_v56  ;;  %v5359_v20 = vpop.f32.mrb[12].mxu0 }
 0x528   : > { %4173 = vmatpush3.msra.mxu1 %v1116_v57  ;;  %v4186_v60 = vpop.f32.mrb[13].mxu0  ;;  %4174 = vmatprep.mubr.msk.f32.mxu1 %vm4791_vm1, %v4790_v14  ;;  %v4473_v62 = vpop.eup %4472 }
 0x529   : > { %4177 = vmatprep.subr.mxu1 %v4790_v14  ;;  %v1035_v5 = vmul.f32 %v4473_v62, %v4467_v49  ;;  %v1346_v12 = vpop.permute.xlu1 %1345 }
 0x52b   : > { %4175 = vmatmul.mubr.msk.f32.vlgmr.msra.gmra.mrb[10].mxu1 %vm683_vm2, %v1034_v61  ;;  %v1497_v2 = vpop.f32.mrb[14].mxu0 }
 0x52c   : > { %4178 = vmatpush3.msra.mxu1 %v1193_v0  ;;  %v1498_v3 = vadd.f32 %v1497_v2, %v5297_v63  ;;  %v4196_v4 = vpop.f32.mrb[15].mxu0  ;;  %4179 = vmatprep.mubr.msk.f32.mxu1 %vm4791_vm1, %v4790_v14 }
 0x52d   : > { %4187 = vmatprep.subr.mxu1 %v4790_v14  ;;  %v1502_v15 = vpop.permute.xlu1 %1501 }
 0x52e   : > { %v1660_v6 = vsel %vm683_vm2, %v1498_v3, -inf }
 0x52f   : > { %v1653_v7 = vpop.f32.mrb[16].mxu0  ;;  %1661 = vmax.xlane.f32.xlu0 %v1660_v6  ;;  %4180 = vmatmul.mubr.msk.f32.vlgmr.msra.gmra.mrb[12].mxu1 %vm683_vm2, %v1035_v5 }
 0x530   : > { %v1654_v9 = vadd.f32 %v1653_v7, %v5279_v54  ;;  %v4206_v10 = vpop.f32.mrb[17].mxu0  ;;  %4189 = vmatprep.mubr.msk.f32.mxu1 %vm4791_vm1, %v4790_v14 }
 0x532   : > { %v1666_v11 = vsel %vm683_vm2, %v1654_v9, -inf }
 0x533   : > { %4188 = vmatpush3.xpose.msk.msra.mxu1 %vm683_vm2, %v1348_v8  ;;  %1667 = vmax.xlane.f32.xlu1 %v1666_v11 }
 0x534   : > { %4197 = vmatprep.subr.mxu1 %v4790_v14 }
 0x536   : > { %4190 = vmatmul.mubr.msk.f32.vlgmr.msra.gmra.mrb[14].mxu1 %vm683_vm2, %v1346_v12 }
 0x537   : > { %4198 = vmatpush3.xpose.msk.msra.mxu1 %vm683_vm2, %v1504_v13  ;;  %4199 = vmatprep.mubr.msk.f32.mxu1 %vm4791_vm1, %v4790_v14 }
 0x538   : > { %4207 = vmatprep.subr.mxu1 %v4790_v14 }
 0x53a   : > { %4200 = vmatmul.mubr.msk.f32.vlgmr.msra.gmra.mrb[16].mxu1 %vm683_vm2, %v1502_v15 }
 0x53b   : > { %4209 = vmatprep.mubr.msk.f32.mxu1 %vm4791_vm1, %v4790_v14 }
 0x544   : > { %1777 = vrot.lane.b32.xlu1 %v5344_v51, %s4796_s13 }
 0x548   : > { %2201 = vrot.lane.b32.xlu1 %v5212_v22, %s4797_s23 }
 0x54c   : > { %2199 = vrot.lane.b32.xlu1 %v5242_v35, %s4798_s17 }
 0x550   : > { %2277 = vrot.lane.b32.xlu1 %v5250_v37, %s4798_s17 }
 0x554   : > { %2355 = vrot.lane.b32.xlu1 %v5260_v41, %s4798_s17 }
 0x558   : > { %2433 = vrot.lane.b32.xlu1 %v5268_v43, %s4798_s17 }
 0x5bc   : > { %v1662_v17 = vpop.xlane.xlu0 %1661 }
 0x5bd   : > { %v1670_v18 = vsub.f32 %v1498_v3, %v1662_v17 }
 0x5bf   : > { %v1675_v19 = vmul.f32 1.442695, %v1670_v18 }
 0x5c0   : > { %v1668_v21 = vpop.xlane.xlu1 %1667 }
 0x5c1   : > { %4474 = vpow2.f32 %v1675_v19  ;;  %v1672_v23 = vsub.f32 %v1654_v9, %v1668_v21 }
 0x5c3   : > { %v1679_v24 = vmul.f32 1.442695, %v1672_v23 }
 0x5c4   : > { %v1778_v28 = vpop.permute.xlu1 %1777 }
 0x5c5   : > { %4476 = vpow2.f32 %v1679_v24  ;;  %4213 = vmatpush3.msra.mxu0 %v1778_v28 }
 0x5c6   : > { %4222 = vmatprep.subr.mxu0 %v4790_v14 }
 0x5c8   : > { %v2202_v58 = vpop.permute.xlu1 %2201 }
 0x5cb   : > { %v4475_v29 = vpop.eup %4474 }
 0x5cc   : > { %v1684_v31 = vsel %vm683_vm2, %v4475_v29, 0.0  ;;  %v2200_v2 = vpop.permute.xlu1 %2199 }
 0x5cd   : > { %1685 = vadd.xlane.f32.xlu0 %v1684_v31 }
 0x5cf   : > { %v4477_v32 = vpop.eup %4476 }
 0x5d0   : > { %v1690_v33 = vsel %vm683_vm2, %v4477_v32, 0.0  ;;  %v2278_v4 = vpop.permute.xlu1 %2277 }
 0x5d1   : > { %1691 = vadd.xlane.f32.xlu0 %v1690_v33 }
 0x5d4   : > { %v2356_v6 = vpop.permute.xlu1 %2355 }
 0x5d8   : > { %v2434_v8 = vpop.permute.xlu1 %2433 }
 0x5e7   : > { %1929 = vrot.lane.b32.xlu0 %v5284_v59, %s4796_s13 }
 0x5eb   : > { %2279 = vrot.lane.b32.xlu0 %v5216_v25, %s4797_s23 }
 0x5ef   : > { %2357 = vrot.lane.b32.xlu0 %v5219_v26, %s4797_s23 }
 0x5f3   : > { %2435 = vrot.lane.b32.xlu0 %v5226_v30, %s4797_s23 }
 0x5fa   : > { %v5400_v34 = vpop.f32.mrb[8].mxu1 }
 0x5fb   : > { %v4171_v36 = vpop.f32.mrb[9].mxu1 }
 0x5fe   : > { %v5402_v38 = vpop.f32.mrb[10].mxu1 }
 0x5ff   : > { %v4176_v39 = vpop.f32.mrb[11].mxu1 }
 0x602   : > { %v5404_v40 = vpop.f32.mrb[12].mxu1 }
 0x603   : > { %v4181_v42 = vpop.f32.mrb[13].mxu1 }
 0x609   : > { %v1419_v45 = vpop.f32.mrb[14].mxu1 }
 0x60a   : > { %v4191_v46 = vpop.f32.mrb[15].mxu1  ;;  %v1420_v47 = vadd.f32 %v1419_v45, %v5312_v16 }
 0x60c   : > { %v1657_v44 = vsel %vm683_vm2, %v1420_v47, -inf }
 0x60d   : > { %v1575_v48 = vpop.f32.mrb[16].mxu1 }
 0x60e   : > { %v1576_v49 = vadd.f32 %v1575_v48, %v5301_v1  ;;  %v4201_v50 = vpop.f32.mrb[17].mxu1 }
 0x610   : > { %v1663_v53 = vsel %vm683_vm2, %v1576_v49, -inf }
 0x611   : > { %1664 = vmax.xlane.f32.xlu1 %v1663_v53 }
 0x612   : > { %1658 = vmax.xlane.f32.xlu0 %v1657_v44 }
 0x622   : > { %1701 = vrot.lane.b32.xlu1 %v5318_v27, %s4796_s13 }
 0x65a   : > { %v1686_v55 = vpop.xlane.xlu0 %1685 }
 0x65b   : > { %4478 = vrcp.f32 %v1686_v55 }
 0x65e   : > { %v1692_v56 = vpop.xlane.xlu0 %1691 }
 0x65f   : > { %4480 = vrcp.f32 %v1692_v56 }
 0x662   : > { %v1930_v61 = vpop.permute.xlu0 %1929 }
 0x665   : > { %v4479_v57 = vpop.eup %4478 }
 0x666   : > { %v1698_v60 = vmul.f32 %v4479_v57, %v4475_v29  ;;  %v2280_v3 = vpop.permute.xlu0 %2279 }
 0x668   : > { %4215 = vmatmul.mubr.msk.f32.vlgmr.msra.gmra.mrb[18].mxu0 %vm683_vm2, %v1698_v60 }
 0x669   : > { %v4481_v62 = vpop.eup %4480  ;;  %4223 = vmatpush3.msra.mxu0 %v1930_v61  ;;  %4224 = vmatprep.mubr.msk.f32.mxu0 %vm4791_vm1, %v4790_v14 }
 0x66a   : > { %v1700_v0 = vmul.f32 %v4481_v62, %v4477_v32  ;;  %4243 = vmatprep.subr.mxu0 %v4790_v14  ;;  %v2358_v5 = vpop.permute.xlu0 %2357 }
 0x66c   : > { %4225 = vmatmul.mubr.msk.f32.vlgmr.msra.gmra.mrb[20].mxu0 %vm683_vm2, %v1700_v0 }
 0x66d   : > { %4245 = vmatprep.mubr.msk.f32.mxu0 %vm4791_vm1, %v4790_v14 }
 0x66e   : > { %v2436_v7 = vpop.permute.xlu0 %2435 }
 0x670   : > { %4244 = vmatpush3.xpose.msk.msra.mxu0 %vm683_vm2, %v2202_v58 }
 0x671   : > { %4248 = vmatprep.subr.mxu0 %v4790_v14 }
 0x673   : > { %4246 = vmatmul.mubr.msk.f32.vlgmr.msra.gmra.mrb[22].mxu0 %vm683_vm2, %v2200_v2 }
 0x674   : > { %4249 = vmatpush3.xpose.msk.msra.mxu0 %vm683_vm2, %v2280_v3  ;;  %4250 = vmatprep.mubr.msk.f32.mxu0 %vm4791_vm1, %v4790_v14 }
 0x675   : > { %4253 = vmatprep.subr.mxu0 %v4790_v14 }
 0x677   : > { %4251 = vmatmul.mubr.msk.f32.vlgmr.msra.gmra.mrb[24].mxu0 %vm683_vm2, %v2278_v4  ;;  %v677_v4 = vld [vmem:[#allocation11 + $0x8] sm:$0xff] }
 0x678   : > { %4254 = vmatpush3.xpose.msk.msra.mxu0 %vm683_vm2, %v2358_v5  ;;  %4255 = vmatprep.mubr.msk.f32.mxu0 %vm4791_vm1, %v4790_v14  ;;  %v676_v5 = vld [vmem:[#allocation11] sm:$0xff] }
 0x679   : > { %4258 = vmatprep.subr.mxu0 %v4790_v14 }
 0x67b   : > { %4256 = vmatmul.mubr.msk.f32.vlgmr.msra.gmra.mrb[26].mxu0 %vm683_vm2, %v2356_v6 }
 0x67c   : > { %4259 = vmatpush3.xpose.msk.msra.mxu0 %vm683_vm2, %v2436_v7  ;;  %4260 = vmatprep.mubr.msk.f32.mxu0 %vm4791_vm1, %v4790_v14 }
 0x67d   : > { %4268 = vmatprep.subr.mxu0 %v4790_v14 }
 0x67f   : > { %4261 = vmatmul.mubr.msk.f32.vlgmr.msra.gmra.mrb[28].mxu0 %vm683_vm2, %v2434_v8 }
 0x680   : > { %4270 = vmatprep.mubr.msk.f32.mxu0 %vm4791_vm1, %v4790_v14 }
 0x69e   : > { %v1665_v9 = vpop.xlane.xlu1 %1664 }
 0x69f   : > { %v1671_v10 = vsub.f32 %v1576_v49, %v1665_v9  ;;  %v1659_v11 = vpop.xlane.xlu0 %1658 }
 0x6a0   : > { %v1669_v12 = vsub.f32 %v1420_v47, %v1659_v11 }
 0x6a1   : > { %v1677_v13 = vmul.f32 1.442695, %v1671_v10 }
 0x6a2   : > { %v1673_v15 = vmul.f32 1.442695, %v1669_v12  ;;  %v1702_v17 = vpop.permute.xlu1 %1701 }
 0x6a3   : > { %4208 = vmatpush3.msra.mxu1 %v1702_v17 }
 0x6a4   : > { %4482 = vpow2.f32 %v1673_v15  ;;  %4217 = vmatprep.subr.mxu1 %v4790_v14 }
 0x6a5   : > { %4484 = vpow2.f32 %v1677_v13 }
 0x6ae   : > { %v4483_v18 = vpop.eup %4482 }
 0x6af   : > { %v1681_v19 = vsel %vm683_vm2, %v4483_v18, 0.0  ;;  %v4485_v21 = vpop.eup %4484 }
 0x6b0   : > { %1682 = vadd.xlane.f32.xlu0 %v1681_v19  ;;  %v1687_v23 = vsel %vm683_vm2, %v4485_v21, 0.0 }
 0x6b4   : > { %1688 = vadd.xlane.f32.xlu0 %v1687_v23 }
 0x6ca   : > { %1853 = vrot.lane.b32.xlu0 %v5350_v52, %s4796_s13 }
 0x73b   : > { %v5444_v24 = vpop.f32.mrb[18].mxu0 }
 0x73c   : > { %v4216_v28 = vpop.f32.mrb[19].mxu0 }
 0x73d   : > { %v1683_v29 = vpop.xlane.xlu0 %1682 }
 0x73e   : > { %4486 = vrcp.f32 %v1683_v29 }
 0x73f   : > { %v5446_v31 = vpop.f32.mrb[20].mxu0 }
 0x740   : > { %v4226_v32 = vpop.f32.mrb[21].mxu0 }
 0x741   : > { %v1689_v33 = vpop.xlane.xlu0 %1688 }
 0x742   : > { %4488 = vrcp.f32 %v1689_v33 }
 0x745   : > { %v1854_v49 = vpop.permute.xlu0 %1853 }
 0x746   : > { %v2273_v36 = vpop.f32.mrb[22].mxu0 }
 0x747   : > { %v2274_v39 = vadd.f32 %v2273_v36, %v5312_v16  ;;  %v4247_v42 = vpop.f32.mrb[23].mxu0 }
 0x748   : > { %v4487_v45 = vpop.eup %4486 }
 0x749   : > { %v1697_v46 = vmul.f32 %v4487_v45, %v4483_v18  ;;  %v2511_v47 = vsel %vm683_vm2, %v2274_v39, -inf }
 0x74a   : > { %v2351_v48 = vpop.f32.mrb[24].mxu0  ;;  %2512 = vmax.xlane.f32.xlu1 %v2511_v47 }
 0x74b   : > { %v2352_v50 = vadd.f32 %v2351_v48, %v5297_v63  ;;  %v4252_v53 = vpop.f32.mrb[25].mxu0  ;;  %4210 = vmatmul.mubr.msk.f32.vlgmr.msra.gmra.mrb[18].mxu1 %vm683_vm2, %v1697_v46 }
 0x74c   : > { %v4489_v44 = vpop.eup %4488  ;;  %4218 = vmatpush3.msra.mxu1 %v1854_v49  ;;  %4219 = vmatprep.mubr.msk.f32.mxu1 %vm4791_vm1, %v4790_v14 }
 0x74d   : > { %v1699_v55 = vmul.f32 %v4489_v44, %v4485_v21  ;;  %v2514_v56 = vsel %vm683_vm2, %v2352_v50, -inf  ;;  %4227 = vmatprep.subr.mxu1 %v677_v4 }
 0x74e   : > { %v2429_v57 = vpop.f32.mrb[26].mxu0  ;;  %2515 = vmax.xlane.f32.xlu0 %v2514_v56 }
 0x74f   : > { %v2430_v58 = vadd.f32 %v2429_v57, %v5301_v1  ;;  %v4257_v60 = vpop.f32.mrb[27].mxu0  ;;  %4220 = vmatmul.mubr.msk.f32.vlgmr.msra.gmra.mrb[20].mxu1 %vm683_vm2, %v1699_v55 }
 0x750   : > { %4228 = vmatpush3.msra.mxu1 %v677_v4 }
 0x751   : > { %v2517_v61 = vsel %vm683_vm2, %v2430_v58, -inf  ;;  %4235 = vmatprep.subr.mxu1 %v676_v5 }
 0x752   : > { %v2507_v62 = vpop.f32.mrb[28].mxu0  ;;  %2518 = vmax.xlane.f32.xlu1 %v2517_v61 }
 0x753   : > { %v2508_v0 = vadd.f32 %v2507_v62, %v5279_v54  ;;  %v4262_v2 = vpop.f32.mrb[29].mxu0 }
 0x755   : > { %v2520_v3 = vsel %vm683_vm2, %v2508_v0, -inf }
 0x756   : > { %2521 = vmax.xlane.f32.xlu0 %v2520_v3 }
 0x763   : > { %2555 = vrot.lane.b32.xlu1 %v5318_v27, %s4799_s24 }
 0x7d7   : > { %v2513_v6 = vpop.xlane.xlu1 %2512 }
 0x7d8   : > { %v2523_v7 = vsub.f32 %v2274_v39, %v2513_v6 }
 0x7da   : > { %v2527_v8 = vmul.f32 1.442695, %v2523_v7 }
 0x7db   : > { %v2516_v9 = vpop.xlane.xlu0 %2515 }
 0x7dc   : > { %4490 = vpow2.f32 %v2527_v8  ;;  %v2524_v10 = vsub.f32 %v2352_v50, %v2516_v9 }
 0x7de   : > { %v2529_v11 = vmul.f32 1.442695, %v2524_v10 }
 0x7df   : > { %v2519_v12 = vpop.xlane.xlu1 %2518 }
 0x7e0   : > { %4492 = vpow2.f32 %v2529_v11  ;;  %v2525_v13 = vsub.f32 %v2430_v58, %v2519_v12 }
 0x7e2   : > { %v2531_v15 = vmul.f32 1.442695, %v2525_v13 }
 0x7e3   : > { %v2522_v17 = vpop.xlane.xlu0 %2521 }
 0x7e4   : > { %4494 = vpow2.f32 %v2531_v15  ;;  %v2526_v18 = vsub.f32 %v2508_v0, %v2522_v17 }
 0x7e6   : > { %v4491_v19 = vpop.eup %4490  ;;  %v2533_v21 = vmul.f32 1.442695, %v2526_v18 }
 0x7e7   : > { %v2535_v23 = vsel %vm683_vm2, %v4491_v19, 0.0 }
 0x7e8   : > { %4496 = vpow2.f32 %v2533_v21  ;;  %2536 = vadd.xlane.f32.xlu1 %v2535_v23 }
 0x7ea   : > { %v4493_v28 = vpop.eup %4492 }
 0x7eb   : > { %v2538_v29 = vsel %vm683_vm2, %v4493_v28, 0.0 }
 0x7ec   : > { %2539 = vadd.xlane.f32.xlu0 %v2538_v29 }
 0x7ee   : > { %v5464_v32 = vpop.eup %4494 }
 0x7ef   : > { %v2541_v33 = vsel %vm683_vm2, %v5464_v32, 0.0 }
 0x7f0   : > { %2542 = vadd.xlane.f32.xlu1 %v2541_v33 }
 0x7f2   : > { %v5468_v36 = vpop.eup %4496 }
 0x7f3   : > { %v2544_v39 = vsel %vm683_vm2, %v5468_v36, 0.0 }
 0x7f4   : > { %2545 = vadd.xlane.f32.xlu0 %v2544_v39 }
 0x801   : > { %2707 = vrot.lane.b32.xlu1 %v5350_v52, %s4799_s24 }
 0x805   : > { %2783 = vrot.lane.b32.xlu1 %v5284_v59, %s4799_s24 }
 0x809   : > { %2960 = vrot.lane.b32.xlu1 %v5242_v35, %s4800_s15 }
 0x80a   : > { %2631 = vrot.lane.b32.xlu0 %v5344_v51, %s4799_s24 }
 0x80d   : > { %3038 = vrot.lane.b32.xlu1 %v5250_v37, %s4800_s15 }
 0x80e   : > { %2962 = vrot.lane.b32.xlu0 %v5212_v22, %s4801_s20 }
 0x811   : > { %3196 = vrot.lane.b32.xlu1 %v5226_v30, %s4801_s20 }
 0x812   : > { %3040 = vrot.lane.b32.xlu0 %v5216_v25, %s4801_s20  ;;  %v2556_v25 = vpop.permute.xlu1 %2555 }
 0x815   : > { %3194 = vrot.lane.b32.xlu1 %v5268_v43, %s4800_s15 }
 0x816   : > { %3118 = vrot.lane.b32.xlu0 %v5219_v26, %s4801_s20 }
 0x81a   : > { %3116 = vrot.lane.b32.xlu0 %v5260_v41, %s4800_s15 }
 0x81e   : > { %v1773_v42 = vpop.f32.mrb[18].mxu1 }
 0x81f   : > { %v4211_v35 = vpop.f32.mrb[19].mxu1  ;;  %4229 = vmatprep.mubr.msk.f32.mxu1 %vm683_vm2, %v1773_v42 }
 0x820   : > { %4230 = vmatmul.mubr.msk.f32.vlgmr.msra.gmra.mrb[22].mxu1 %vm683_vm2, %v5444_v24 }
 0x821   : > { %4236 = vmatpush3.msra.mxu1 %v676_v5 }
 0x822   : > { %v1925_v37 = vpop.f32.mrb[20].mxu1  ;;  %4263 = vmatprep.subr.mxu1 %v4790_v14 }
 0x823   : > { %v4221_v22 = vpop.f32.mrb[21].mxu1  ;;  %4232 = vmatprep.mubr.msk.f32.mxu1 %vm683_vm2, %v1925_v37 }
 0x824   : > { %4233 = vmatmul.mubr.msk.f32.gmra.mrb[24].mxu1 %vm683_vm2, %v5446_v31 }
 0x825   : > { %4237 = vmatprep.mubr.msk.f32.mxu1 %vm683_vm2, %v5400_v34 }
 0x828   : > { %4238 = vmatmul.mubr.msk.f32.vlgmr.msra.gmra.mrb[22].mxu1 %vm683_vm2, %v5402_v38 }
 0x829   : > { %4264 = vmatpush3.msra.mxu1 %v2556_v25  ;;  %4240 = vmatprep.mubr.msk.f32.mxu1 %vm683_vm2, %v5404_v40  ;;  %v678_v40 = vld [vmem:[#allocation11 + $0x10] sm:$0xff] }
 0x82a   : > { %4273 = vmatprep.subr.mxu1 %v4790_v14 }
 0x82c   : > { %4241 = vmatmul.mubr.msk.f32.gmra.mrb[24].mxu1 %vm683_vm2, %v5359_v20 }
 0x82d   : > { %4265 = vmatprep.mubr.msk.f32.mxu1 %vm4791_vm1, %v4790_v14 }
 0x875   : > { %v2537_v26 = vpop.xlane.xlu1 %2536 }
 0x876   : > { %4498 = vrcp.f32 %v2537_v26 }
 0x879   : > { %v2540_v30 = vpop.xlane.xlu0 %2539 }
 0x87a   : > { %4500 = vrcp.f32 %v2540_v30 }
 0x87d   : > { %v2543_v41 = vpop.xlane.xlu1 %2542 }
 0x87e   : > { %4502 = vrcp.f32 %v2543_v41 }
 0x880   : > { %v4499_v43 = vpop.eup %4498 }
 0x881   : > { %v2551_v34 = vmul.f32 %v4499_v43, %v4491_v19  ;;  %v2546_v38 = vpop.xlane.xlu0 %2545  ;;  %v2708_v24 = vpop.permute.xlu1 %2707 }
 0x882   : > { %4504 = vrcp.f32 %v2546_v38 }
 0x883   : > { %4266 = vmatmul.mubr.msk.f32.vlgmr.msra.gmra.mrb[26].mxu1 %vm683_vm2, %v2551_v34 }
 0x884   : > { %v4501_v31 = vpop.eup %4500  ;;  %4274 = vmatpush3.msra.mxu1 %v2708_v24  ;;  %4275 = vmatprep.mubr.msk.f32.mxu1 %vm4791_vm1, %v4790_v14 }
 0x885   : > { %v2552_v20 = vmul.f32 %v4501_v31, %v4493_v28  ;;  %v2632_v45 = vpop.permute.xlu0 %2631  ;;  %v2784_v46 = vpop.permute.xlu1 %2783  ;;  %4283 = vmatprep.subr.mxu1 %v678_v40 }
 0x886   : > { %4269 = vmatpush3.msra.mxu0 %v2632_v45 }
 0x887   : > { %4271 = vmatmul.mubr.msk.f32.vlgmr.msra.gmra.mrb[30].mxu0 %vm683_vm2, %v2552_v20  ;;  %4278 = vmatprep.subr.mxu0 %v4790_v14 }
 0x888   : > { %v4503_v47 = vpop.eup %4502  ;;  %4279 = vmatpush3.msra.mxu0 %v2784_v46  ;;  %4280 = vmatprep.mubr.msk.f32.mxu0 %vm4791_vm1, %v4790_v14 }
 0x889   : > { %v2553_v48 = vmul.f32 %v4503_v47, %v5464_v32  ;;  %v2961_v49 = vpop.permute.xlu1 %2960  ;;  %4291 = vmatprep.subr.mxu0 %v4790_v14  ;;  %v2963_v44 = vpop.permute.xlu0 %2962  ;;  %v679_v47 = vld [vmem:[#allocation11 + $0x18] sm:$0xff] }
 0x88b   : > { %4276 = vmatmul.mubr.msk.f32.vlgmr.msra.gmra.mrb[28].mxu1 %vm683_vm2, %v2553_v48 }
 0x88c   : > { %v4505_v50 = vpop.eup %4504  ;;  %4284 = vmatpush3.msra.mxu1 %v678_v40 }
 0x88d   : > { %v2554_v53 = vmul.f32 %v4505_v50, %v5468_v36  ;;  %4301 = vmatprep.subr.mxu1 %v4790_v14  ;;  %v3039_v55 = vpop.permute.xlu1 %3038  ;;  %v3041_v56 = vpop.permute.xlu0 %3040 }
 0x88f   : > { %4281 = vmatmul.mubr.msk.f32.vlgmr.msra.gmra.mrb[32].mxu0 %vm683_vm2, %v2554_v53 }
 0x890   : > { %4292 = vmatpush3.xpose.msk.msra.mxu0 %vm683_vm2, %v2963_v44  ;;  %4293 = vmatprep.mubr.msk.f32.mxu0 %vm4791_vm1, %v4790_v14 }
 0x891   : > { %4296 = vmatprep.subr.mxu0 %v4790_v14  ;;  %v3197_v57 = vpop.permute.xlu1 %3196  ;;  %v3119_v0 = vpop.permute.xlu0 %3118 }
 0x893   : > { %4294 = vmatmul.mubr.msk.f32.vlgmr.msra.gmra.mrb[34].mxu0 %vm683_vm2, %v2961_v49 }
 0x894   : > { %4297 = vmatpush3.xpose.msk.msra.mxu0 %vm683_vm2, %v3041_v56  ;;  %4298 = vmatprep.mubr.msk.f32.mxu0 %vm4791_vm1, %v4790_v14 }
 0x895   : > { %4306 = vmatprep.subr.mxu0 %v4790_v14  ;;  %v3195_v58 = vpop.permute.xlu1 %3194  ;;  %v3117_v7 = vpop.permute.xlu0 %3116 }
 0x897   : > { %4299 = vmatmul.mubr.msk.f32.vlgmr.msra.gmra.mrb[36].mxu0 %vm683_vm2, %v3039_v55 }
 0x898   : > { %4307 = vmatpush3.xpose.msk.msra.mxu0 %vm683_vm2, %v3197_v57  ;;  %4308 = vmatprep.mubr.msk.f32.mxu0 %vm4791_vm1, %v4790_v14 }
 0x899   : > { %4316 = vmatprep.subr.mxu0 %v4790_v14 }
 0x89b   : > { %4309 = vmatmul.mubr.msk.f32.vlgmr.msra.gmra.mrb[38].mxu0 %vm683_vm2, %v3195_v58 }
 0x89c   : > { %4318 = vmatprep.mubr.msk.f32.mxu0 %vm4791_vm1, %v4790_v14 }
 0x956   : > { %v2627_v60 = vpop.f32.mrb[26].mxu1 }
 0x957   : > { %v4267_v61 = vpop.f32.mrb[27].mxu1  ;;  %4285 = vmatprep.mubr.msk.f32.mxu1 %vm683_vm2, %v2627_v60 }
 0x95a   : > { %v2703_v62 = vpop.f32.mrb[30].mxu0 }
 0x95b   : > { %v4272_v2 = vpop.f32.mrb[31].mxu0  ;;  %4286 = vmatmul.mubr.msk.f32.vlgmr.msra.gmra.mrb[22].mxu1 %vm683_vm2, %v2703_v62 }
 0x95c   : > { %4302 = vmatpush3.xpose.msk.msra.mxu1 %vm683_vm2, %v3119_v0 }
 0x95d   : > { %4311 = vmatprep.subr.mxu1 %v4790_v14 }
 0x95e   : > { %v2779_v3 = vpop.f32.mrb[28].mxu1 }
 0x95f   : > { %v4277_v4 = vpop.f32.mrb[29].mxu1  ;;  %4288 = vmatprep.mubr.msk.f32.mxu1 %vm683_vm2, %v2779_v3 }
 0x962   : > { %v2855_v5 = vpop.f32.mrb[32].mxu0 }
 0x963   : > { %v4282_v6 = vpop.f32.mrb[33].mxu0  ;;  %4289 = vmatmul.mubr.msk.f32.gmra.mrb[24].mxu1 %vm683_vm2, %v2855_v5  ;;  %v4010_v5 = vld [vmem:[%s5708_s19] ss:$0 sm:$0xff] }
 0x964   : > { %4303 = vmatprep.mubr.msk.f32.mxu1 %vm4791_vm1, %v4790_v14 }
 0x966   : > { %v3034_v8 = vpop.f32.mrb[34].mxu0 }
 0x967   : > { %v3035_v9 = vadd.f32 %v3034_v8, %v5312_v16  ;;  %v4295_v10 = vpop.f32.mrb[35].mxu0  ;;  %4304 = vmatmul.mubr.msk.f32.vlgmr.msra.gmra.mrb[30].mxu1 %vm683_vm2, %v3117_v7 }
 0x968   : > { %4313 = vmatprep.mubr.msk.f32.mxu1 %vm4791_vm1, %v4790_v14 }
 0x969   : > { %v3272_v11 = vsel %vm683_vm2, %v3035_v9, -inf }
 0x96a   : > { %3273 = vmax.xlane.f32.xlu0 %v3272_v11  ;;  %v3112_v12 = vpop.f32.mrb[36].mxu0 }
 0x96b   : > { %v3113_v13 = vadd.f32 %v3112_v12, %v5297_v63  ;;  %v4300_v15 = vpop.f32.mrb[37].mxu0 }
 0x96d   : > { %v3275_v17 = vsel %vm683_vm2, %v3113_v13, -inf }
 0x96e   : > { %3276 = vmax.xlane.f32.xlu1 %v3275_v17  ;;  %v3268_v18 = vpop.f32.mrb[38].mxu0 }
 0x96f   : > { %v4310_v19 = vpop.f32.mrb[39].mxu0  ;;  %v3269_v35 = vadd.f32 %v3268_v18, %v5279_v54 }
 0x971   : > { %v3281_v22 = vsel %vm683_vm2, %v3269_v35, -inf }
 0x9f7   : > { %v3274_v21 = vpop.xlane.xlu0 %3273 }
 0x9f8   : > { %v3284_v16 = vsub.f32 %v3035_v9, %v3274_v21 }
 0x9fa   : > { %v3288_v23 = vmul.f32 1.442695, %v3284_v16 }
 0x9fb   : > { %v3277_v63 = vpop.xlane.xlu1 %3276 }
 0x9fc   : > { %4506 = vpow2.f32 %v3288_v23  ;;  %v3285_v32 = vsub.f32 %v3113_v13, %v3277_v63 }
 0x9fe   : > { %v3290_v33 = vmul.f32 1.442695, %v3285_v32 }
 0xa00   : > { %4508 = vpow2.f32 %v3290_v33 }
 0xa06   : > { %v4507_v28 = vpop.eup %4506 }
 0xa07   : > { %v3296_v29 = vsel %vm683_vm2, %v4507_v28, 0.0 }
 0xa08   : > { %3297 = vadd.xlane.f32.xlu1 %v3296_v29 }
 0xa0a   : > { %v4509_v25 = vpop.eup %4508 }
 0xa19   : > { %3316 = vrot.lane.b32.xlu1 %v5318_v27, %s4802_s7  ;;  %v3299_v27 = vsel %vm683_vm2, %v4509_v25, 0.0 }
 0xa1d   : > { %3468 = vrot.lane.b32.xlu1 %v5350_v52, %s4802_s7 }
 0xa3a   : > { %v3190_v36 = vpop.f32.mrb[30].mxu1 }
 0xa3b   : > { %v3191_v39 = vadd.f32 %v3190_v36, %v5301_v1  ;;  %v4305_v42 = vpop.f32.mrb[31].mxu1 }
 0xa3d   : > { %v3278_v37 = vsel %vm683_vm2, %v3191_v39, -inf }
 0xa3e   : > { %3279 = vmax.xlane.f32.xlu0 %v3278_v37 }
 0xa42   : > { %3282 = vmax.xlane.f32.xlu0 %v3281_v22 }
 0xa46   : > { %3300 = vadd.xlane.f32.xlu0 %v3299_v27 }
 0xa95   : > { %v3298_v52 = vpop.xlane.xlu1 %3297 }
 0xa96   : > { %4510 = vrcp.f32 %v3298_v52 }
 0xa99   : > { %v3317_v26 = vpop.permute.xlu1 %3316 }
 0xa9a   : > { %4312 = vmatpush3.msra.mxu1 %v3317_v26 }
 0xa9b   : > { %4321 = vmatprep.subr.mxu1 %v4790_v14 }
 0xa9d   : > { %v3469_v41 = vpop.permute.xlu1 %3468 }
 0xaa0   : > { %v4511_v1 = vpop.eup %4510 }
 0xaa1   : > { %v3312_v30 = vmul.f32 %v4511_v1, %v4507_v28 }
 0xaa3   : > { %4314 = vmatmul.mubr.msk.f32.vlgmr.msra.gmra.mrb[32].mxu1 %vm683_vm2, %v3312_v30 }
 0xaa4   : > { %4322 = vmatpush3.msra.mxu1 %v3469_v41  ;;  %4323 = vmatprep.mubr.msk.f32.mxu1 %vm4791_vm1, %v4790_v14 }
 0xaa5   : > { %4331 = vmatprep.subr.mxu1 %v679_v47 }
 0xacb   : > { %v3280_v54 = vpop.xlane.xlu0 %3279 }
 0xacc   : > { %v3286_v43 = vsub.f32 %v3191_v39, %v3280_v54 }
 0xace   : > { %v3292_v34 = vmul.f32 1.442695, %v3286_v43 }
 0xacf   : > { %v3283_v38 = vpop.xlane.xlu0 %3282 }
 0xad0   : > { %4512 = vpow2.f32 %v3292_v34  ;;  %v3287_v24 = vsub.f32 %v3269_v35, %v3283_v38 }
 0xad2   : > { %v3294_v40 = vmul.f32 1.442695, %v3287_v24 }
 0xad3   : > { %v3301_v48 = vpop.xlane.xlu0 %3300 }
 0xad4   : > { %4514 = vpow2.f32 %v3294_v40 }
 0xad5   : > { %4516 = vrcp.f32 %v3301_v48 }
 0xada   : > { %v4513_v31 = vpop.eup %4512 }
 0xadb   : > { %v3302_v20 = vsel %vm683_vm2, %v4513_v31, 0.0 }
 0xadc   : > { %3303 = vadd.xlane.f32.xlu1 %v3302_v20 }
 0xade   : > { %v4515_v45 = vpop.eup %4514 }
 0xadf   : > { %v3305_v46 = vsel %vm683_vm2, %v4515_v45, 0.0  ;;  %v4517_v53 = vpop.eup %4516 }
 0xae0   : > { %3306 = vadd.xlane.f32.xlu0 %v3305_v46  ;;  %v3313_v44 = vmul.f32 %v4517_v53, %v4509_v25 }
 0xaed   : > { %3544 = vrot.lane.b32.xlu1 %v5284_v59, %s4802_s7 }
 0xaf6   : > { %3392 = vrot.lane.b32.xlu0 %v5344_v51, %s4802_s7 }
 0xb69   : > { %v3304_v49 = vpop.xlane.xlu1 %3303 }
 0xb6a   : > { %4518 = vrcp.f32 %v3304_v49 }
 0xb6d   : > { %v3307_v50 = vpop.xlane.xlu0 %3306  ;;  %v3545_v56 = vpop.permute.xlu1 %3544 }
 0xb6e   : > { %4520 = vrcp.f32 %v3307_v50 }
 0xb71   : > { %v3393_v55 = vpop.permute.xlu0 %3392 }
 0xb72   : > { %4317 = vmatpush3.msra.mxu0 %v3393_v55 }
 0xb73   : > { %4319 = vmatmul.mubr.msk.f32.vlgmr.msra.gmra.mrb[40].mxu0 %vm683_vm2, %v3313_v44  ;;  %4326 = vmatprep.subr.mxu0 %v4790_v14 }
 0xb74   : > { %v4519_v59 = vpop.eup %4518  ;;  %4327 = vmatpush3.msra.mxu0 %v3545_v56  ;;  %4328 = vmatprep.mubr.msk.f32.mxu0 %vm4791_vm1, %v4790_v14 }
 0xb75   : > { %v3314_v51 = vmul.f32 %v4519_v59, %v4513_v31 }
 0xb76   : > { %v3388_v57 = vpop.f32.mrb[32].mxu1 }
 0xb77   : > { %v4315_v58 = vpop.f32.mrb[33].mxu1  ;;  %4324 = vmatmul.mubr.msk.f32.vlgmr.msra.gmra.mrb[34].mxu1 %vm683_vm2, %v3314_v51 }
 0xb78   : > { %v4521_v60 = vpop.eup %4520  ;;  %4333 = vmatprep.mubr.msk.f32.mxu1 %vm683_vm2, %v3388_v57  ;;  %4332 = vmatpush3.msra.mxu1 %v679_v47 }
 0xb79   : > { %v3315_v61 = vmul.f32 %v4521_v60, %v4515_v45 }
 0xb7b   : > { %4329 = vmatmul.mubr.msk.f32.vlgmr.msra.gmra.mrb[42].mxu0 %vm683_vm2, %v3315_v61 }
 0xc46   : > { %v3464_v62 = vpop.f32.mrb[40].mxu0 }
 0xc47   : > { %v4320_v0 = vpop.f32.mrb[41].mxu0  ;;  %4334 = vmatmul.mubr.msk.f32.vlgmr.msra.gmra.mrb[22].mxu1 %vm683_vm2, %v3464_v62 }
 0xc4a   : > { %v3540_v2 = vpop.f32.mrb[34].mxu1 }
 0xc4b   : > { %v4325_v14 = vpop.f32.mrb[35].mxu1  ;;  %4336 = vmatprep.mubr.msk.f32.mxu1 %vm683_vm2, %v3540_v2 }
 0xc4e   : > { %v3616_v3 = vpop.f32.mrb[42].mxu0 }
 0xc4f   : > { %v4330_v4 = vpop.f32.mrb[43].mxu0  ;;  %4337 = vmatmul.mubr.msk.f32.gmra.mrb[24].mxu1 %vm683_vm2, %v3616_v3 }
 0xd1a   : > { %v4335_v6 = vpop.f32.mrb[22].mxu1 }
 0xd1b   : > { %v3729_v7 = vadd.f32 %v4335_v6, %v4010_v5  ;;  %v3698_v8 = vpop.f32.mrb[23].mxu1 }
 0xd1c   : > { %v3728_v9 = vadd.f32 %v4010_v5, %v3698_v8 }
 0xd1d   : > { %3733 = vst.msk [vmem:[%s469_s14 + $0x8] sm:$0xff] %vm498_vm0, %v3729_v7 }
 0xd1e   : > { %3732 = vst.msk [vmem:[%s469_s14] sm:$0xff] %vm498_vm0, %v3728_v9 }
 0xd22   : > { %v4338_v10 = vpop.f32.mrb[24].mxu1 }
 0xd23   : > { %v3731_v11 = vadd.f32 %v4338_v10, %v4010_v5  ;;  %v3708_v12 = vpop.f32.mrb[25].mxu1 }
 0xd24   : > { %v3730_v13 = vadd.f32 %v4010_v5, %v3708_v12 }
 0xd25   : > { %3735 = vst.msk [vmem:[%s469_s14 + $0x18] sm:$0xff] %vm498_vm0, %v3731_v11 }
 0xd26   : > { %3734 = vst.msk [vmem:[%s469_s14 + $0x10] sm:$0xff] %vm498_vm0, %v3730_v13 }
 0xd27   : > { %4711 = shalt.err (!%p4708_p0)
}
 0xd28   : > { %s4712_s13 = scalar_lea.hbm %s5591_s22, 512  ;;  %s4716_s24 = scalar_lea.hbm %s5710_s8, 1024 }
 0xd29   : > { %p4713_p12 = scmp.ne.s32.totalorder %s5591_s22, %s4712_s13  ;;  %p4717_p6 = scmp.lt.u32.totalorder %s5591_s22, %s5710_s8 }
 0xd2a   : > { %p4718_p2 = scmp.lt.u32.totalorder %s4716_s24, %s4712_s13  ;;  %p4720_p10 = scmp.lt.u32.totalorder %s4712_s13, %s5591_s22 }
 0xd2b   : > { %p4714_p3 = pnand %p4713_p12, %p5711_p1 }
 0xd2c   : > { %p4719_p8 = por %p4718_p2, %p4717_p6 }
 0xd2d   : > { %p4715_p9 = pneg %p4714_p3 }
 0xd2e   : > { %p4721_p5 = por %p4720_p10, %p4719_p8 }
 0xd30   : > { %p4722_p11 = pnand %p4721_p5, %p4715_p9 }
 0xd32   : > { %4725 = shalt.err (!%p4722_p11)
}
 0xd33   : > { %s4804_s7 = smov 128   ;;  %s4805_s12 = smov 8  }
 0xd34   : > { %4375 = dma.vmem_to_hbm [thread:$0]  (%p5711_p1), %s5586_s27, 512, %s5591_s22, %s3737_s18, %s4804_s7, %s4804_s7, %s4805_s12  }
 0xd35 PF: > { %s5712_s0 = sld [smem:[#allocation20_spill]]  ;;  %s5713_s19 = sld [smem:[#allocation24_spill]] }
 0xd36   : > { %p5715_p13 = scmp.ge.s32.totalorder %s4780_s30, 2 }
 0xd3b   : > { %s3765_s14 = sand.u32 1, %s5712_s0   ;;  %p5714_p4 = scmp.ne.s32.totalorder %s5713_s19, 0 }
 0xd3c   : > { %s3766_s26 = scalar_lea.sflag [#allocation4], %s3765_s14 }
 0xd3d   : > { %p4398_p7 = pnand %p5715_p13, %p5714_p4 }
 0xd3f   : > { %4763 = dma.done.wait (!%p4398_p7), %s3766_s26, 512  }
 0xd40   : > { %4765 = vsyncadd (!%p4398_p7), %s3766_s26, 4294966784  ;;  %s5716_s30 = sld [smem:[#allocation21_spill]]  ;;  %s5717_s11 = sld [smem:[#allocation22_spill]] }
 0xd41   : > { %s5718_s27 = smov %s4772_s28  ;;  %s5719_s28 = smov %s4776_s29 }
 0xd46   : > { %p28_p0 = scmp.ge.s32.totalorder %s5716_s30, 4   ;;  %s5720_s29 = smov %s5717_s11 }
 0xd48   :  { %30 = sbr.rel (!%p28_p0) target bundleno = 16 (0x10), region = 142 }
 0xd4f   :  { %3771 = vsyncpa [#allocation3], 1 }
 0xd50   :  { %3773 = vsyncpa [#allocation3 + $0x1], 1 }
 0xd51   :  { %3774 = vsyncpa [#allocation6], 1 }
 0xd52   :  { %3776 = vsyncpa [#allocation6 + $0x1], 1 }
 0xd53   :  { %3777 = vsyncpa [#allocation9], 1 }
 0xd54   :  { %3779 = vsyncpa [#allocation9 + $0x1], 1 }
 0xd55   :  { %3780 = vsyncpa [#allocation12], 1 }
 0xd56   :  { %3781 = vsyncpa [#allocation4], 1 }
 0xd57   :  { %3783 = vsyncpa [#allocation4 + $0x1], 1 }

</bundles_post_ra>
